<compile_context>
chip_gen: v7x
topology: tpu7x:2x2x1
jax: 0.10.0
libtpu: 0.0.40
codegen_flags: <defaults>
</compile_context>

<pallas_src>
import functools

import jax
import jax.numpy as jnp
from jax.experimental import pallas as pl
from jax.experimental.pallas import tpu as pltpu

_PADW = 8  # sublane-aligned padding on each side of the conv2 staging scratch


def _bottleneck_kernel(
    x_ref,        # (1, TR, W, Cin)  input row-strip (auto-pipelined)
    xtop_ref,     # (1, 1, W, Cin)   row just above the strip (edge-clamped)
    xbot_ref,     # (1, 1, W, Cin)   row just below the strip (edge-clamped)
    w1_ref,       # (Cin, P)         conv1 1x1 weight
    s1_ref,       # (1, P)           bn1 folded scale (f32)
    b1_ref,       # (1, P)           bn1 folded bias  (f32)
    w2_ref,       # (3, 3, P, P)     conv2 3x3 weight (HWIO)
    s2_ref,       # (1, P)
    b2_ref,       # (1, P)
    w3_ref,       # (P, Cout)        conv3 1x1 weight
    s3_ref,       # (1, Cout)
    b3_ref,       # (1, Cout)
    o_ref,        # (1, TR, W, Cout) output row-strip
    t1pad_ref,    # VMEM (TR+2, W+2*_PADW, P) f32 : W-padded, row-haloed conv1 out
    *, TR, W, Cin, P, Cout,
):
    r = pl.program_id(1)
    last_r = pl.num_programs(1) - 1
    f32 = jnp.float32
    cdt = w1_ref.dtype          # compute dtype for MXU operands (f32 or bf16)

    def conv1(x2d):             # relu(bn1(x @ w1)) in f32
        t = jax.lax.dot_general(x2d, w1_ref[...], (((1,), (0,)), ((), ())),
                                preferred_element_type=f32)
        return jnp.maximum(t * s1_ref[0] + b1_ref[0], 0.0)

    # ---- conv1 (1x1) + bn1 + relu : one 2-D MXU matmul, M = TR * W ----
    t1_mid = conv1(x_ref[0].reshape(TR * W, Cin)).reshape(TR, W, P)

    # conv1 recomputed on the two halo rows; zeroed when outside the image so
    # that conv2 sees zero padding of the *activation* (matches the reference).
    t1_top = jnp.where(r == 0, 0.0, conv1(xtop_ref[0, 0]))        # (W, P)
    t1_bot = jnp.where(r == last_r, 0.0, conv1(xbot_ref[0, 0]))   # (W, P)

    # ---- stage the haloed activation in a W-padded VMEM scratch ----
    # Interior store lands at sublane-aligned column offset _PADW; only the two
    # 8-wide pad bands are zeroed (not the whole buffer, every step is cheap
    # and safe under "parallel"/megacore splitting).
    t1pad_ref[:, 0:_PADW, :] = jnp.zeros((TR + 2, _PADW, P), f32)
    t1pad_ref[:, _PADW + W:2 * _PADW + W, :] = jnp.zeros((TR + 2, _PADW, P), f32)
    t1pad_ref[0:1, _PADW:_PADW + W, :] = t1_top.reshape(1, W, P)
    t1pad_ref[1:TR + 1, _PADW:_PADW + W, :] = t1_mid
    t1pad_ref[TR + 1:TR + 2, _PADW:_PADW + W, :] = t1_bot.reshape(1, W, P)

    # ---- conv2 (3x3, pad=1, stride=1) + bn2 + relu ----
    # 9 accumulating channel-contraction matmuls.  Row taps (ky) are free
    # leading-axis slices; column taps (kx) read at offsets _PADW-1/_PADW/_PADW+1
    # of the padded axis.  First tap initializes the accumulator (no zeros+add).
    acc = None
    for ky in range(3):
        for kx in range(3):
            lhs = t1pad_ref[ky:ky + TR, _PADW - 1 + kx:_PADW - 1 + kx + W, :]
            lhs = lhs.reshape(TR * W, P).astype(cdt)
            d = jax.lax.dot_general(lhs, w2_ref[ky, kx],
                                    (((1,), (0,)), ((), ())),
                                    preferred_element_type=f32)
            acc = d if acc is None else acc + d
    t2 = jnp.maximum(acc * s2_ref[0] + b2_ref[0], 0.0)            # (TR*W, P)

    # ---- conv3 (1x1) + bn3 + residual + relu ----
    t3 = jax.lax.dot_general(t2.astype(cdt), w3_ref[...],
                             (((1,), (0,)), ((), ())),
                             preferred_element_type=f32)
    # Re-read x here (instead of keeping it live across conv2) so vreg pressure
    # stays low where it peaks.
    resid = x_ref[0].reshape(TR * W, Cin).astype(f32)
    out = jnp.maximum(t3 * s3_ref[0] + b3_ref[0] + resid, 0.0)
    o_ref[0] = out.reshape(TR, W, Cout).astype(o_ref.dtype)


def bottleneck_pallas(x_nhwc, params, *, compute_dtype=jnp.float32,
                      tile_rows=None):
    """x_nhwc: (N, H, W, Cin) float32, Cin == planes*4 (downsample is None)."""
    N, H, W, Cin = x_nhwc.shape
    P = params["w1"].shape[1]
    Cout = params["w3"].shape[1]
    assert Cin == Cout, "downsample is None => inplanes must equal planes*4"
    assert params["w2"].shape == (3, 3, P, P)

    if tile_rows is None:
        tile_rows = next(t for t in (16, 8, 4, 2, 1) if H % t == 0)
    TR = min(tile_rows, H)
    assert H % TR == 0, "tile_rows must divide H"
    n_strips = H // TR

    cdt = jnp.dtype(compute_dtype)
    x_c = x_nhwc.astype(cdt)
    w1 = params["w1"].astype(cdt)
    w2 = params["w2"].astype(cdt)
    w3 = params["w3"].astype(cdt)

    kernel = functools.partial(_bottleneck_kernel,
                               TR=TR, W=W, Cin=Cin, P=P, Cout=Cout)

    def _full(shape):
        return pl.BlockSpec(shape, lambda n, r: (0,) * len(shape))

    # ---- explicit VMEM budget (keeps double-buffering alive on v5e/v7x) ----
    acc_b = 4
    in_blk = TR * W * Cin * cdt.itemsize
    out_blk = TR * W * Cout * acc_b
    wts_b = (Cin * P + 9 * P * P + P * Cout) * cdt.itemsize
    sb_b = 2 * (P + P + Cout) * acc_b
    halo_b = 2 * 2 * W * Cin * cdt.itemsize
    t1pad_b = (TR + 2) * (W + 2 * _PADW) * P * acc_b
    live_b = TR * W * (2 * P + Cout) * acc_b
    vmem_est = 2 * (in_blk + out_blk) + 2 * (wts_b + sb_b) + halo_b + t1pad_b + live_b
    vmem_limit = int(min(max(2 * vmem_est, 16 * 1024 * 1024), 48 * 1024 * 1024))

    flops = 2 * N * H * W * (Cin * P + 9 * P * P + P * Cout)
    bytes_accessed = int(N * H * W * Cin * cdt.itemsize * (1.0 + 2.0 / TR)
                         + N * H * W * Cout * acc_b + wts_b + sb_b)

    grid_spec = pltpu.PrefetchScalarGridSpec(
        num_scalar_prefetch=0,
        grid=(N, n_strips),
        in_specs=[
            # main row-strip of x
            pl.BlockSpec((1, TR, W, Cin), lambda n, r: (n, r, 0, 0)),
            # single halo rows above/below the strip (clamped at image edges;
            # the kernel zeroes their conv1 output when outside the image)
            pl.BlockSpec((1, 1, W, Cin),
                         lambda n, r: (n, jnp.maximum(r * TR - 1, 0), 0, 0)),
            pl.BlockSpec((1, 1, W, Cin),
                         lambda n, r: (n, jnp.minimum(r * TR + TR, H - 1), 0, 0)),
            _full((Cin, P)),
            _full((1, P)), _full((1, P)),
            _full((3, 3, P, P)),
            _full((1, P)), _full((1, P)),
            _full((P, Cout)),
            _full((1, Cout)), _full((1, Cout)),
        ],
        out_specs=pl.BlockSpec((1, TR, W, Cout), lambda n, r: (n, r, 0, 0)),
        scratch_shapes=[
            pltpu.VMEM((TR + 2, W + 2 * _PADW, P), jnp.float32),
        ],
    )

    return pl.pallas_call(
        kernel,
        out_shape=jax.ShapeDtypeStruct((N, H, W, Cout), jnp.float32),
        grid_spec=grid_spec,
        compiler_params=pltpu.CompilerParams(
            dimension_semantics=("parallel", "parallel"),
            vmem_limit_bytes=vmem_limit),
        cost_estimate=pl.CostEstimate(flops=flops, transcendentals=0,
                                      bytes_accessed=bytes_accessed),
    )(
        x_c, x_c, x_c,
        w1, params["s1"], params["b1"],
        w2, params["s2"], params["b2"],
        w3, params["s3"], params["b3"],
    )


def _fold_bn(gamma, beta, mean, var, eps=1e-5):
    scale = gamma / jnp.sqrt(var + eps)
    bias = beta - mean * scale
    return (scale.reshape(1, -1).astype(jnp.float32),
            bias.reshape(1, -1).astype(jnp.float32))


def make_params(key, inplanes, planes):
    expansion = 4
    keys = jax.random.split(key, 6)
    std1 = 1.0 / jnp.sqrt(inplanes)
    std2 = 1.0 / jnp.sqrt(9.0 * planes)
    std3 = 1.0 / jnp.sqrt(planes)

    w1 = jax.random.normal(keys[0], (inplanes, planes), jnp.float32) * std1
    w2 = jax.random.normal(keys[1], (3, 3, planes, planes), jnp.float32) * std2  # HWIO
    w3 = jax.random.normal(keys[2], (planes, planes * expansion), jnp.float32) * std3

    def bn_stats(k, c):
        k1, k2, k3, k4 = jax.random.split(k, 4)
        gamma = 1.0 + 0.1 * jax.random.normal(k1, (c,), jnp.float32)
        beta = 0.1 * jax.random.normal(k2, (c,), jnp.float32)
        mean = 0.1 * jax.random.normal(k3, (c,), jnp.float32)
        var = 1.0 + 0.1 * jax.random.uniform(k4, (c,), jnp.float32)
        return gamma, beta, mean, var

    s1, b1 = _fold_bn(*bn_stats(keys[3], planes))
    s2, b2 = _fold_bn(*bn_stats(keys[4], planes))
    s3, b3 = _fold_bn(*bn_stats(keys[5], planes * expansion))

    return dict(w1=w1, s1=s1, b1=b1, w2=w2, s2=s2, b2=b2, w3=w3, s3=s3, b3=b3)


def reference_bottleneck(x_nhwc, params):
    """Pure-JAX reference using lax.conv (NHWC / HWIO), f32."""
    dn = ("NHWC", "HWIO", "NHWC")
    w1 = params["w1"].reshape(1, 1, *params["w1"].shape)
    w3 = params["w3"].reshape(1, 1, *params["w3"].shape)

    t = jax.lax.conv_general_dilated(x_nhwc, w1, (1, 1), "VALID",
                                     dimension_numbers=dn)
    t = jnp.maximum(t * params["s1"][0] + params["b1"][0], 0.0)
    t = jax.lax.conv_general_dilated(t, params["w2"], (1, 1),
                                     ((1, 1), (1, 1)), dimension_numbers=dn)
    t = jnp.maximum(t * params["s2"][0] + params["b2"][0], 0.0)
    t = jax.lax.conv_general_dilated(t, w3, (1, 1), "VALID",
                                     dimension_numbers=dn)
    t = t * params["s3"][0] + params["b3"][0] + x_nhwc
    return jnp.maximum(t, 0.0)


if __name__ == "__main__":
    # Small shapes consistent with the module: downsample=None requires
    # inplanes == planes * expansion.
    N, H, W = 2, 16, 16
    planes = 8
    inplanes = planes * 4  # 32

    key = jax.random.PRNGKey(0)
    k_x, k_p = jax.random.split(key)

    # PyTorch-convention input is NCHW; generate it that way, then go NHWC.
    x_nchw = jax.random.normal(k_x, (N, inplanes, H, W), jnp.float32)
    x_nhwc = jnp.transpose(x_nchw, (0, 2, 3, 1))
    params = make_params(k_p, inplanes, planes)

    ref_nhwc = reference_bottleneck(x_nhwc, params)

    # f32 path; tile_rows=8 -> 2 row-strips per image, exercising the halo path.
    out_f32 = jax.block_until_ready(
        bottleneck_pallas(x_nhwc, params, compute_dtype=jnp.float32,
                          tile_rows=8))
    assert out_f32.shape == (N, H, W, planes * 4)
    err32 = float(jnp.max(jnp.abs(out_f32 - ref_nhwc)))
    assert jnp.allclose(out_f32, ref_nhwc, atol=2e-3, rtol=2e-3), err32

    # bf16 operands (MXU-friendly on v6e/v7x), f32 accumulation; looser check
    # against the f32 reference because inputs/weights are rounded to bf16.
    out_bf16 = jax.block_until_ready(
        bottleneck_pallas(x_nhwc, params, compute_dtype=jnp.bfloat16,
                          tile_rows=8))
    errbf = float(jnp.max(jnp.abs(out_bf16 - ref_nhwc)))
    assert jnp.allclose(out_bf16, ref_nhwc, atol=0.25, rtol=0.1), errbf

    # Back to PyTorch NCHW convention for the final result.
    out_nchw = jnp.transpose(out_f32, (0, 3, 1, 2))
    jax.block_until_ready(out_nchw)
    print("KERNEL_OK")
</pallas_src>

<mosaic_0001>
module attributes {stable_mosaic.version = 11 : i64} {
  func.func @_bottleneck_kernel(%arg0: i32, %arg1: i32, %arg2: memref<1x8x16x32xf32, #tpu.memory_space<vmem>>, %arg3: memref<1x1x16x32xf32, #tpu.memory_space<vmem>>, %arg4: memref<1x1x16x32xf32, #tpu.memory_space<vmem>>, %arg5: memref<32x8xf32, #tpu.memory_space<vmem>>, %arg6: memref<1x8xf32, #tpu.memory_space<vmem>>, %arg7: memref<1x8xf32, #tpu.memory_space<vmem>>, %arg8: memref<3x3x8x8xf32, #tpu.memory_space<vmem>>, %arg9: memref<1x8xf32, #tpu.memory_space<vmem>>, %arg10: memref<1x8xf32, #tpu.memory_space<vmem>>, %arg11: memref<8x32xf32, #tpu.memory_space<vmem>>, %arg12: memref<1x32xf32, #tpu.memory_space<vmem>>, %arg13: memref<1x32xf32, #tpu.memory_space<vmem>>, %arg14: memref<1x8x16x32xf32, #tpu.memory_space<vmem>>, %arg15: memref<10x32x8xf32, #tpu.memory_space<vmem>>) attributes {dimension_semantics = [#tpu.dimension_semantics<parallel>, #tpu.dimension_semantics<parallel>], iteration_bounds = array<i64: 2, 2>, scalar_prefetch = 0 : i64, scratch_operands = 1 : i64, tpu.core_type = #tpu.core_type<tc>, window_params = [{transform_indices = @transform_0, window_bounds = array<i64: 1, 8, 16, 32>}, {transform_indices = @transform_1, window_bounds = array<i64: 1, 1, 16, 32>}, {transform_indices = @transform_2, window_bounds = array<i64: 1, 1, 16, 32>}, {pipeline_mode = #tpu.pipeline_mode<synchronous>, transform_indices = @transform_3, window_bounds = array<i64: 32, 8>}, {pipeline_mode = #tpu.pipeline_mode<synchronous>, transform_indices = @transform_4, window_bounds = array<i64: 1, 8>}, {pipeline_mode = #tpu.pipeline_mode<synchronous>, transform_indices = @transform_5, window_bounds = array<i64: 1, 8>}, {pipeline_mode = #tpu.pipeline_mode<synchronous>, transform_indices = @transform_6, window_bounds = array<i64: 3, 3, 8, 8>}, {pipeline_mode = #tpu.pipeline_mode<synchronous>, transform_indices = @transform_7, window_bounds = array<i64: 1, 8>}, {pipeline_mode = #tpu.pipeline_mode<synchronous>, transform_indices = @transform_8, window_bounds = array<i64: 1, 8>}, {pipeline_mode = #tpu.pipeline_mode<synchronous>, transform_indices = @transform_9, window_bounds = array<i64: 8, 32>}, {pipeline_mode = #tpu.pipeline_mode<synchronous>, transform_indices = @transform_10, window_bounds = array<i64: 1, 32>}, {pipeline_mode = #tpu.pipeline_mode<synchronous>, transform_indices = @transform_11, window_bounds = array<i64: 1, 32>}, {transform_indices = @transform_12, window_bounds = array<i64: 1, 8, 16, 32>}]} {
    %c0 = arith.constant 0 : index
    %c0_0 = arith.constant 0 : index
    %c0_1 = arith.constant 0 : index
    %c0_2 = arith.constant 0 : index
    %0 = vector.load %arg2[%c0, %c0_0, %c0_1, %c0_2] : memref<1x8x16x32xf32, #tpu.memory_space<vmem>>, vector<1x8x16x32xf32>
    %1 = vector.shape_cast %0 : vector<1x8x16x32xf32> to vector<8x16x32xf32>
    %2 = vector.shape_cast %1 : vector<8x16x32xf32> to vector<128x32xf32>
    %c0_3 = arith.constant 0 : index
    %c0_4 = arith.constant 0 : index
    %3 = vector.load %arg5[%c0_3, %c0_4] : memref<32x8xf32, #tpu.memory_space<vmem>>, vector<32x8xf32>
    %cst = arith.constant dense<0.000000e+00> : vector<128x8xf32>
    %4 = tpu.matmul %2, %3, %cst {dimension_numbers = #tpu.dot_dimension_numbers<[1], [0], [0], [1], [0, 0, 1, 1], [], []>} : vector<128x32xf32>, vector<32x8xf32>, vector<128x8xf32> -> vector<128x8xf32>
    %c0_5 = arith.constant 0 : index
    %c0_6 = arith.constant 0 : index
    %5 = vector.load %arg6[%c0_5, %c0_6] : memref<1x8xf32, #tpu.memory_space<vmem>>, vector<1x8xf32>
    %6 = vector.shape_cast %5 : vector<1x8xf32> to vector<8xf32>
    %7 = vector.shape_cast %6 : vector<8xf32> to vector<1x8xf32>
    %8 = vector.broadcast %7 : vector<1x8xf32> to vector<128x8xf32>
    %9 = arith.mulf %4, %8 : vector<128x8xf32>
    %c0_7 = arith.constant 0 : index
    %c0_8 = arith.constant 0 : index
    %10 = vector.load %arg7[%c0_7, %c0_8] : memref<1x8xf32, #tpu.memory_space<vmem>>, vector<1x8xf32>
    %11 = vector.shape_cast %10 : vector<1x8xf32> to vector<8xf32>
    %12 = vector.shape_cast %11 : vector<8xf32> to vector<1x8xf32>
    %13 = vector.broadcast %12 : vector<1x8xf32> to vector<128x8xf32>
    %14 = arith.addf %9, %13 : vector<128x8xf32>
    %cst_9 = arith.constant 0.000000e+00 : f32
    %15 = vector.broadcast %cst_9 : f32 to vector<128x8xf32>
    %16 = arith.maximumf %14, %15 : vector<128x8xf32>
    %17 = vector.shape_cast %16 : vector<128x8xf32> to vector<8x16x8xf32>
    %c0_i32 = arith.constant 0 : i32
    %18 = arith.cmpi eq, %arg1, %c0_i32 : i32
    %c0_10 = arith.constant 0 : index
    %c0_11 = arith.constant 0 : index
    %c0_12 = arith.constant 0 : index
    %c0_13 = arith.constant 0 : index
    %19 = vector.load %arg3[%c0_10, %c0_11, %c0_12, %c0_13] : memref<1x1x16x32xf32, #tpu.memory_space<vmem>>, vector<1x1x16x32xf32>
    %20 = vector.shape_cast %19 : vector<1x1x16x32xf32> to vector<16x32xf32>
    %c0_14 = arith.constant 0 : index
    %c0_15 = arith.constant 0 : index
    %21 = vector.load %arg5[%c0_14, %c0_15] : memref<32x8xf32, #tpu.memory_space<vmem>>, vector<32x8xf32>
    %cst_16 = arith.constant dense<0.000000e+00> : vector<16x8xf32>
    %22 = tpu.matmul %20, %21, %cst_16 {dimension_numbers = #tpu.dot_dimension_numbers<[1], [0], [0], [1], [0, 0, 1, 1], [], []>} : vector<16x32xf32>, vector<32x8xf32>, vector<16x8xf32> -> vector<16x8xf32>
    %c0_17 = arith.constant 0 : index
    %c0_18 = arith.constant 0 : index
    %23 = vector.load %arg6[%c0_17, %c0_18] : memref<1x8xf32, #tpu.memory_space<vmem>>, vector<1x8xf32>
    %24 = vector.shape_cast %23 : vector<1x8xf32> to vector<8xf32>
    %25 = vector.shape_cast %24 : vector<8xf32> to vector<1x8xf32>
    %26 = vector.broadcast %25 : vector<1x8xf32> to vector<16x8xf32>
    %27 = arith.mulf %22, %26 : vector<16x8xf32>
    %c0_19 = arith.constant 0 : index
    %c0_20 = arith.constant 0 : index
    %28 = vector.load %arg7[%c0_19, %c0_20] : memref<1x8xf32, #tpu.memory_space<vmem>>, vector<1x8xf32>
    %29 = vector.shape_cast %28 : vector<1x8xf32> to vector<8xf32>
    %30 = vector.shape_cast %29 : vector<8xf32> to vector<1x8xf32>
    %31 = vector.broadcast %30 : vector<1x8xf32> to vector<16x8xf32>
    %32 = arith.addf %27, %31 : vector<16x8xf32>
    %cst_21 = arith.constant 0.000000e+00 : f32
    %33 = vector.broadcast %cst_21 : f32 to vector<16x8xf32>
    %34 = arith.maximumf %32, %33 : vector<16x8xf32>
    %cst_22 = arith.constant 0.000000e+00 : f32
    %35 = vector.broadcast %cst_22 : f32 to vector<16x8xf32>
    %36 = arith.select %18, %35, %34 : vector<16x8xf32>
    %c1_i32 = arith.constant 1 : i32
    %37 = arith.cmpi eq, %arg1, %c1_i32 : i32
    %c0_23 = arith.constant 0 : index
    %c0_24 = arith.constant 0 : index
    %c0_25 = arith.constant 0 : index
    %c0_26 = arith.constant 0 : index
    %38 = vector.load %arg4[%c0_23, %c0_24, %c0_25, %c0_26] : memref<1x1x16x32xf32, #tpu.memory_space<vmem>>, vector<1x1x16x32xf32>
    %39 = vector.shape_cast %38 : vector<1x1x16x32xf32> to vector<16x32xf32>
    %c0_27 = arith.constant 0 : index
    %c0_28 = arith.constant 0 : index
    %40 = vector.load %arg5[%c0_27, %c0_28] : memref<32x8xf32, #tpu.memory_space<vmem>>, vector<32x8xf32>
    %cst_29 = arith.constant dense<0.000000e+00> : vector<16x8xf32>
    %41 = tpu.matmul %39, %40, %cst_29 {dimension_numbers = #tpu.dot_dimension_numbers<[1], [0], [0], [1], [0, 0, 1, 1], [], []>} : vector<16x32xf32>, vector<32x8xf32>, vector<16x8xf32> -> vector<16x8xf32>
    %c0_30 = arith.constant 0 : index
    %c0_31 = arith.constant 0 : index
    %42 = vector.load %arg6[%c0_30, %c0_31] : memref<1x8xf32, #tpu.memory_space<vmem>>, vector<1x8xf32>
    %43 = vector.shape_cast %42 : vector<1x8xf32> to vector<8xf32>
    %44 = vector.shape_cast %43 : vector<8xf32> to vector<1x8xf32>
    %45 = vector.broadcast %44 : vector<1x8xf32> to vector<16x8xf32>
    %46 = arith.mulf %41, %45 : vector<16x8xf32>
    %c0_32 = arith.constant 0 : index
    %c0_33 = arith.constant 0 : index
    %47 = vector.load %arg7[%c0_32, %c0_33] : memref<1x8xf32, #tpu.memory_space<vmem>>, vector<1x8xf32>
    %48 = vector.shape_cast %47 : vector<1x8xf32> to vector<8xf32>
    %49 = vector.shape_cast %48 : vector<8xf32> to vector<1x8xf32>
    %50 = vector.broadcast %49 : vector<1x8xf32> to vector<16x8xf32>
    %51 = arith.addf %46, %50 : vector<16x8xf32>
    %cst_34 = arith.constant 0.000000e+00 : f32
    %52 = vector.broadcast %cst_34 : f32 to vector<16x8xf32>
    %53 = arith.maximumf %51, %52 : vector<16x8xf32>
    %cst_35 = arith.constant 0.000000e+00 : f32
    %54 = vector.broadcast %cst_35 : f32 to vector<16x8xf32>
    %55 = arith.select %37, %54, %53 : vector<16x8xf32>
    %cst_36 = arith.constant 0.000000e+00 : f32
    %56 = vector.broadcast %cst_36 : f32 to vector<10x8x8xf32>
    %c0_37 = arith.constant 0 : index
    %c0_38 = arith.constant 0 : index
    %c0_39 = arith.constant 0 : index
    %57 = vector.load %arg15[%c0_37, %c0_38, %c0_39] : memref<10x32x8xf32, #tpu.memory_space<vmem>>, vector<10x8x8xf32>
    tpu.vector_store %arg15[%c0_37, %c0_38, %c0_39], %56 {strides = array<i32>} : memref<10x32x8xf32, #tpu.memory_space<vmem>>, vector<10x8x8xf32>,
    %cst_40 = arith.constant 0.000000e+00 : f32
    %58 = vector.broadcast %cst_40 : f32 to vector<10x8x8xf32>
    %c0_41 = arith.constant 0 : index
    %c24 = arith.constant 24 : index
    %c0_42 = arith.constant 0 : index
    %59 = vector.load %arg15[%c0_41, %c24, %c0_42] : memref<10x32x8xf32, #tpu.memory_space<vmem>>, vector<10x8x8xf32>
    tpu.vector_store %arg15[%c0_41, %c24, %c0_42], %58 {strides = array<i32>} : memref<10x32x8xf32, #tpu.memory_space<vmem>>, vector<10x8x8xf32>,
    %60 = vector.shape_cast %36 : vector<16x8xf32> to vector<1x16x8xf32>
    %c0_43 = arith.constant 0 : index
    %c8 = arith.constant 8 : index
    %c0_44 = arith.constant 0 : index
    %61 = vector.load %arg15[%c0_43, %c8, %c0_44] : memref<10x32x8xf32, #tpu.memory_space<vmem>>, vector<1x16x8xf32>
    tpu.vector_store %arg15[%c0_43, %c8, %c0_44], %60 {strides = array<i32>} : memref<10x32x8xf32, #tpu.memory_space<vmem>>, vector<1x16x8xf32>,
    %c1 = arith.constant 1 : index
    %c8_45 = arith.constant 8 : index
    %c0_46 = arith.constant 0 : index
    %62 = vector.load %arg15[%c1, %c8_45, %c0_46] : memref<10x32x8xf32, #tpu.memory_space<vmem>>, vector<8x16x8xf32>
    tpu.vector_store %arg15[%c1, %c8_45, %c0_46], %17 {strides = array<i32>} : memref<10x32x8xf32, #tpu.memory_space<vmem>>, vector<8x16x8xf32>,
    %63 = vector.shape_cast %55 : vector<16x8xf32> to vector<1x16x8xf32>
    %c9 = arith.constant 9 : index
    %c8_47 = arith.constant 8 : index
    %c0_48 = arith.constant 0 : index
    %64 = vector.load %arg15[%c9, %c8_47, %c0_48] : memref<10x32x8xf32, #tpu.memory_space<vmem>>, vector<1x16x8xf32>
    tpu.vector_store %arg15[%c9, %c8_47, %c0_48], %63 {strides = array<i32>} : memref<10x32x8xf32, #tpu.memory_space<vmem>>, vector<1x16x8xf32>,
    %c0_49 = arith.constant 0 : index
    %c7 = arith.constant 7 : index
    %c0_50 = arith.constant 0 : index
    %65 = vector.load %arg15[%c0_49, %c7, %c0_50] : memref<10x32x8xf32, #tpu.memory_space<vmem>>, vector<8x16x8xf32>
    %66 = vector.shape_cast %65 : vector<8x16x8xf32> to vector<128x8xf32>
    %c0_51 = arith.constant 0 : index
    %c0_52 = arith.constant 0 : index
    %c0_53 = arith.constant 0 : index
    %c0_54 = arith.constant 0 : index
    %67 = vector.load %arg8[%c0_51, %c0_52, %c0_53, %c0_54] : memref<3x3x8x8xf32, #tpu.memory_space<vmem>>, vector<1x1x8x8xf32>
    %68 = vector.shape_cast %67 : vector<1x1x8x8xf32> to vector<8x8xf32>
    %cst_55 = arith.constant dense<0.000000e+00> : vector<128x8xf32>
    %69 = tpu.matmul %66, %68, %cst_55 {dimension_numbers = #tpu.dot_dimension_numbers<[1], [0], [0], [1], [0, 0, 1, 1], [], []>} : vector<128x8xf32>, vector<8x8xf32>, vector<128x8xf32> -> vector<128x8xf32>
    %c0_56 = arith.constant 0 : index
    %c8_57 = arith.constant 8 : index
    %c0_58 = arith.constant 0 : index
    %70 = vector.load %arg15[%c0_56, %c8_57, %c0_58] : memref<10x32x8xf32, #tpu.memory_space<vmem>>, vector<8x16x8xf32>
    %71 = vector.shape_cast %70 : vector<8x16x8xf32> to vector<128x8xf32>
    %c0_59 = arith.constant 0 : index
    %c1_60 = arith.constant 1 : index
    %c0_61 = arith.constant 0 : index
    %c0_62 = arith.constant 0 : index
    %72 = vector.load %arg8[%c0_59, %c1_60, %c0_61, %c0_62] : memref<3x3x8x8xf32, #tpu.memory_space<vmem>>, vector<1x1x8x8xf32>
    %73 = vector.shape_cast %72 : vector<1x1x8x8xf32> to vector<8x8xf32>
    %cst_63 = arith.constant dense<0.000000e+00> : vector<128x8xf32>
    %74 = tpu.matmul %71, %73, %cst_63 {dimension_numbers = #tpu.dot_dimension_numbers<[1], [0], [0], [1], [0, 0, 1, 1], [], []>} : vector<128x8xf32>, vector<8x8xf32>, vector<128x8xf32> -> vector<128x8xf32>
    %75 = arith.addf %69, %74 : vector<128x8xf32>
    %c0_64 = arith.constant 0 : index
    %c9_65 = arith.constant 9 : index
    %c0_66 = arith.constant 0 : index
    %76 = vector.load %arg15[%c0_64, %c9_65, %c0_66] : memref<10x32x8xf32, #tpu.memory_space<vmem>>, vector<8x16x8xf32>
    %77 = vector.shape_cast %76 : vector<8x16x8xf32> to vector<128x8xf32>
    %c0_67 = arith.constant 0 : index
    %c2 = arith.constant 2 : index
    %c0_68 = arith.constant 0 : index
    %c0_69 = arith.constant 0 : index
    %78 = vector.load %arg8[%c0_67, %c2, %c0_68, %c0_69] : memref<3x3x8x8xf32, #tpu.memory_space<vmem>>, vector<1x1x8x8xf32>
    %79 = vector.shape_cast %78 : vector<1x1x8x8xf32> to vector<8x8xf32>
    %cst_70 = arith.constant dense<0.000000e+00> : vector<128x8xf32>
    %80 = tpu.matmul %77, %79, %cst_70 {dimension_numbers = #tpu.dot_dimension_numbers<[1], [0], [0], [1], [0, 0, 1, 1], [], []>} : vector<128x8xf32>, vector<8x8xf32>, vector<128x8xf32> -> vector<128x8xf32>
    %81 = arith.addf %75, %80 : vector<128x8xf32>
    %c1_71 = arith.constant 1 : index
    %c7_72 = arith.constant 7 : index
    %c0_73 = arith.constant 0 : index
    %82 = vector.load %arg15[%c1_71, %c7_72, %c0_73] : memref<10x32x8xf32, #tpu.memory_space<vmem>>, vector<8x16x8xf32>
    %83 = vector.shape_cast %82 : vector<8x16x8xf32> to vector<128x8xf32>
    %c1_74 = arith.constant 1 : index
    %c0_75 = arith.constant 0 : index
    %c0_76 = arith.constant 0 : index
    %c0_77 = arith.constant 0 : index
    %84 = vector.load %arg8[%c1_74, %c0_75, %c0_76, %c0_77] : memref<3x3x8x8xf32, #tpu.memory_space<vmem>>, vector<1x1x8x8xf32>
    %85 = vector.shape_cast %84 : vector<1x1x8x8xf32> to vector<8x8xf32>
    %cst_78 = arith.constant dense<0.000000e+00> : vector<128x8xf32>
    %86 = tpu.matmul %83, %85, %cst_78 {dimension_numbers = #tpu.dot_dimension_numbers<[1], [0], [0], [1], [0, 0, 1, 1], [], []>} : vector<128x8xf32>, vector<8x8xf32>, vector<128x8xf32> -> vector<128x8xf32>
    %87 = arith.addf %81, %86 : vector<128x8xf32>
    %c1_79 = arith.constant 1 : index
    %c8_80 = arith.constant 8 : index
    %c0_81 = arith.constant 0 : index
    %88 = vector.load %arg15[%c1_79, %c8_80, %c0_81] : memref<10x32x8xf32, #tpu.memory_space<vmem>>, vector<8x16x8xf32>
    %89 = vector.shape_cast %88 : vector<8x16x8xf32> to vector<128x8xf32>
    %c1_82 = arith.constant 1 : index
    %c1_83 = arith.constant 1 : index
    %c0_84 = arith.constant 0 : index
    %c0_85 = arith.constant 0 : index
    %90 = vector.load %arg8[%c1_82, %c1_83, %c0_84, %c0_85] : memref<3x3x8x8xf32, #tpu.memory_space<vmem>>, vector<1x1x8x8xf32>
    %91 = vector.shape_cast %90 : vector<1x1x8x8xf32> to vector<8x8xf32>
    %cst_86 = arith.constant dense<0.000000e+00> : vector<128x8xf32>
    %92 = tpu.matmul %89, %91, %cst_86 {dimension_numbers = #tpu.dot_dimension_numbers<[1], [0], [0], [1], [0, 0, 1, 1], [], []>} : vector<128x8xf32>, vector<8x8xf32>, vector<128x8xf32> -> vector<128x8xf32>
    %93 = arith.addf %87, %92 : vector<128x8xf32>
    %c1_87 = arith.constant 1 : index
    %c9_88 = arith.constant 9 : index
    %c0_89 = arith.constant 0 : index
    %94 = vector.load %arg15[%c1_87, %c9_88, %c0_89] : memref<10x32x8xf32, #tpu.memory_space<vmem>>, vector<8x16x8xf32>
    %95 = vector.shape_cast %94 : vector<8x16x8xf32> to vector<128x8xf32>
    %c1_90 = arith.constant 1 : index
    %c2_91 = arith.constant 2 : index
    %c0_92 = arith.constant 0 : index
    %c0_93 = arith.constant 0 : index
    %96 = vector.load %arg8[%c1_90, %c2_91, %c0_92, %c0_93] : memref<3x3x8x8xf32, #tpu.memory_space<vmem>>, vector<1x1x8x8xf32>
    %97 = vector.shape_cast %96 : vector<1x1x8x8xf32> to vector<8x8xf32>
    %cst_94 = arith.constant dense<0.000000e+00> : vector<128x8xf32>
    %98 = tpu.matmul %95, %97, %cst_94 {dimension_numbers = #tpu.dot_dimension_numbers<[1], [0], [0], [1], [0, 0, 1, 1], [], []>} : vector<128x8xf32>, vector<8x8xf32>, vector<128x8xf32> -> vector<128x8xf32>
    %99 = arith.addf %93, %98 : vector<128x8xf32>
    %c2_95 = arith.constant 2 : index
    %c7_96 = arith.constant 7 : index
    %c0_97 = arith.constant 0 : index
    %100 = vector.load %arg15[%c2_95, %c7_96, %c0_97] : memref<10x32x8xf32, #tpu.memory_space<vmem>>, vector<8x16x8xf32>
    %101 = vector.shape_cast %100 : vector<8x16x8xf32> to vector<128x8xf32>
    %c2_98 = arith.constant 2 : index
    %c0_99 = arith.constant 0 : index
    %c0_100 = arith.constant 0 : index
    %c0_101 = arith.constant 0 : index
    %102 = vector.load %arg8[%c2_98, %c0_99, %c0_100, %c0_101] : memref<3x3x8x8xf32, #tpu.memory_space<vmem>>, vector<1x1x8x8xf32>
    %103 = vector.shape_cast %102 : vector<1x1x8x8xf32> to vector<8x8xf32>
    %cst_102 = arith.constant dense<0.000000e+00> : vector<128x8xf32>
    %104 = tpu.matmul %101, %103, %cst_102 {dimension_numbers = #tpu.dot_dimension_numbers<[1], [0], [0], [1], [0, 0, 1, 1], [], []>} : vector<128x8xf32>, vector<8x8xf32>, vector<128x8xf32> -> vector<128x8xf32>
    %105 = arith.addf %99, %104 : vector<128x8xf32>
    %c2_103 = arith.constant 2 : index
    %c8_104 = arith.constant 8 : index
    %c0_105 = arith.constant 0 : index
    %106 = vector.load %arg15[%c2_103, %c8_104, %c0_105] : memref<10x32x8xf32, #tpu.memory_space<vmem>>, vector<8x16x8xf32>
    %107 = vector.shape_cast %106 : vector<8x16x8xf32> to vector<128x8xf32>
    %c2_106 = arith.constant 2 : index
    %c1_107 = arith.constant 1 : index
    %c0_108 = arith.constant 0 : index
    %c0_109 = arith.constant 0 : index
    %108 = vector.load %arg8[%c2_106, %c1_107, %c0_108, %c0_109] : memref<3x3x8x8xf32, #tpu.memory_space<vmem>>, vector<1x1x8x8xf32>
    %109 = vector.shape_cast %108 : vector<1x1x8x8xf32> to vector<8x8xf32>
    %cst_110 = arith.constant dense<0.000000e+00> : vector<128x8xf32>
    %110 = tpu.matmul %107, %109, %cst_110 {dimension_numbers = #tpu.dot_dimension_numbers<[1], [0], [0], [1], [0, 0, 1, 1], [], []>} : vector<128x8xf32>, vector<8x8xf32>, vector<128x8xf32> -> vector<128x8xf32>
    %111 = arith.addf %105, %110 : vector<128x8xf32>
    %c2_111 = arith.constant 2 : index
    %c9_112 = arith.constant 9 : index
    %c0_113 = arith.constant 0 : index
    %112 = vector.load %arg15[%c2_111, %c9_112, %c0_113] : memref<10x32x8xf32, #tpu.memory_space<vmem>>, vector<8x16x8xf32>
    %113 = vector.shape_cast %112 : vector<8x16x8xf32> to vector<128x8xf32>
    %c2_114 = arith.constant 2 : index
    %c2_115 = arith.constant 2 : index
    %c0_116 = arith.constant 0 : index
    %c0_117 = arith.constant 0 : index
    %114 = vector.load %arg8[%c2_114, %c2_115, %c0_116, %c0_117] : memref<3x3x8x8xf32, #tpu.memory_space<vmem>>, vector<1x1x8x8xf32>
    %115 = vector.shape_cast %114 : vector<1x1x8x8xf32> to vector<8x8xf32>
    %cst_118 = arith.constant dense<0.000000e+00> : vector<128x8xf32>
    %116 = tpu.matmul %113, %115, %cst_118 {dimension_numbers = #tpu.dot_dimension_numbers<[1], [0], [0], [1], [0, 0, 1, 1], [], []>} : vector<128x8xf32>, vector<8x8xf32>, vector<128x8xf32> -> vector<128x8xf32>
    %117 = arith.addf %111, %116 : vector<128x8xf32>
    %c0_119 = arith.constant 0 : index
    %c0_120 = arith.constant 0 : index
    %118 = vector.load %arg9[%c0_119, %c0_120] : memref<1x8xf32, #tpu.memory_space<vmem>>, vector<1x8xf32>
    %119 = vector.shape_cast %118 : vector<1x8xf32> to vector<8xf32>
    %120 = vector.shape_cast %119 : vector<8xf32> to vector<1x8xf32>
    %121 = vector.broadcast %120 : vector<1x8xf32> to vector<128x8xf32>
    %122 = arith.mulf %117, %121 : vector<128x8xf32>
    %c0_121 = arith.constant 0 : index
    %c0_122 = arith.constant 0 : index
    %123 = vector.load %arg10[%c0_121, %c0_122] : memref<1x8xf32, #tpu.memory_space<vmem>>, vector<1x8xf32>
    %124 = vector.shape_cast %123 : vector<1x8xf32> to vector<8xf32>
    %125 = vector.shape_cast %124 : vector<8xf32> to vector<1x8xf32>
    %126 = vector.broadcast %125 : vector<1x8xf32> to vector<128x8xf32>
    %127 = arith.addf %122, %126 : vector<128x8xf32>
    %cst_123 = arith.constant 0.000000e+00 : f32
    %128 = vector.broadcast %cst_123 : f32 to vector<128x8xf32>
    %129 = arith.maximumf %127, %128 : vector<128x8xf32>
    %c0_124 = arith.constant 0 : index
    %c0_125 = arith.constant 0 : index
    %130 = vector.load %arg11[%c0_124, %c0_125] : memref<8x32xf32, #tpu.memory_space<vmem>>, vector<8x32xf32>
    %cst_126 = arith.constant dense<0.000000e+00> : vector<128x32xf32>
    %131 = tpu.matmul %129, %130, %cst_126 {dimension_numbers = #tpu.dot_dimension_numbers<[1], [0], [0], [1], [0, 0, 1, 1], [], []>} : vector<128x8xf32>, vector<8x32xf32>, vector<128x32xf32> -> vector<128x32xf32>
    %c0_127 = arith.constant 0 : index
    %c0_128 = arith.constant 0 : index
    %c0_129 = arith.constant 0 : index
    %c0_130 = arith.constant 0 : index
    %132 = vector.load %arg2[%c0_127, %c0_128, %c0_129, %c0_130] : memref<1x8x16x32xf32, #tpu.memory_space<vmem>>, vector<1x8x16x32xf32>
    %133 = vector.shape_cast %132 : vector<1x8x16x32xf32> to vector<8x16x32xf32>
    %134 = vector.shape_cast %133 : vector<8x16x32xf32> to vector<128x32xf32>
    %c0_131 = arith.constant 0 : index
    %c0_132 = arith.constant 0 : index
    %135 = vector.load %arg12[%c0_131, %c0_132] : memref<1x32xf32, #tpu.memory_space<vmem>>, vector<1x32xf32>
    %136 = vector.shape_cast %135 : vector<1x32xf32> to vector<32xf32>
    %137 = vector.shape_cast %136 : vector<32xf32> to vector<1x32xf32>
    %138 = vector.broadcast %137 : vector<1x32xf32> to vector<128x32xf32>
    %139 = arith.mulf %131, %138 : vector<128x32xf32>
    %c0_133 = arith.constant 0 : index
    %c0_134 = arith.constant 0 : index
    %140 = vector.load %arg13[%c0_133, %c0_134] : memref<1x32xf32, #tpu.memory_space<vmem>>, vector<1x32xf32>
    %141 = vector.shape_cast %140 : vector<1x32xf32> to vector<32xf32>
    %142 = vector.shape_cast %141 : vector<32xf32> to vector<1x32xf32>
    %143 = vector.broadcast %142 : vector<1x32xf32> to vector<128x32xf32>
    %144 = arith.addf %139, %143 : vector<128x32xf32>
    %145 = arith.addf %144, %134 : vector<128x32xf32>
    %cst_135 = arith.constant 0.000000e+00 : f32
    %146 = vector.broadcast %cst_135 : f32 to vector<128x32xf32>
    %147 = arith.maximumf %145, %146 : vector<128x32xf32>
    %148 = vector.shape_cast %147 : vector<128x32xf32> to vector<8x16x32xf32>
    %c0_136 = arith.constant 0 : index
    %c0_137 = arith.constant 0 : index
    %c0_138 = arith.constant 0 : index
    %c0_139 = arith.constant 0 : index
    %149 = vector.load %arg14[%c0_136, %c0_137, %c0_138, %c0_139] : memref<1x8x16x32xf32, #tpu.memory_space<vmem>>, vector<1x8x16x32xf32>
    %150 = vector.shape_cast %149 : vector<1x8x16x32xf32> to vector<8x16x32xf32>
    %151 = vector.shape_cast %148 : vector<8x16x32xf32> to vector<1x8x16x32xf32>
    tpu.vector_store %arg14[%c0_136, %c0_137, %c0_138, %c0_139], %151 {strides = array<i32>} : memref<1x8x16x32xf32, #tpu.memory_space<vmem>>, vector<1x8x16x32xf32>,
    return
  }
  func.func @transform_0(%arg0: i32, %arg1: i32) -> (i32, i32, i32, i32) {
    %c0_i32 = arith.constant 0 : i32
    %c0_i32_0 = arith.constant 0 : i32
    %c0_i32_1 = arith.constant 0 : i32
    return %arg0, %arg1, %c0_i32, %c0_i32_0 : i32, i32, i32, i32
  }
  func.func @transform_1(%arg0: i32, %arg1: i32) -> (i32, i32, i32, i32) {
    %c8_i32 = arith.constant 8 : i32
    %0 = arith.muli %arg1, %c8_i32 : i32
    %c1_i32 = arith.constant 1 : i32
    %1 = arith.subi %0, %c1_i32 : i32
    %c0_i32 = arith.constant 0 : i32
    %2 = arith.maxsi %1, %c0_i32 : i32
    %c0_i32_0 = arith.constant 0 : i32
    %c0_i32_1 = arith.constant 0 : i32
    %c0_i32_2 = arith.constant 0 : i32
    return %arg0, %2, %c0_i32_0, %c0_i32_1 : i32, i32, i32, i32
  }
  func.func @transform_2(%arg0: i32, %arg1: i32) -> (i32, i32, i32, i32) {
    %c8_i32 = arith.constant 8 : i32
    %0 = arith.muli %arg1, %c8_i32 : i32
    %c8_i32_0 = arith.constant 8 : i32
    %1 = arith.addi %0, %c8_i32_0 : i32
    %c15_i32 = arith.constant 15 : i32
    %2 = arith.minsi %1, %c15_i32 : i32
    %c0_i32 = arith.constant 0 : i32
    %c0_i32_1 = arith.constant 0 : i32
    %c0_i32_2 = arith.constant 0 : i32
    return %arg0, %2, %c0_i32, %c0_i32_1 : i32, i32, i32, i32
  }
  func.func @transform_3(%arg0: i32, %arg1: i32) -> (i32, i32) {
    %c0_i32 = arith.constant 0 : i32
    %c0_i32_0 = arith.constant 0 : i32
    %c0_i32_1 = arith.constant 0 : i32
    return %c0_i32, %c0_i32_0 : i32, i32
  }
  func.func @transform_4(%arg0: i32, %arg1: i32) -> (i32, i32) {
    %c0_i32 = arith.constant 0 : i32
    %c0_i32_0 = arith.constant 0 : i32
    %c0_i32_1 = arith.constant 0 : i32
    return %c0_i32, %c0_i32_0 : i32, i32
  }
  func.func @transform_5(%arg0: i32, %arg1: i32) -> (i32, i32) {
    %c0_i32 = arith.constant 0 : i32
    %c0_i32_0 = arith.constant 0 : i32
    %c0_i32_1 = arith.constant 0 : i32
    return %c0_i32, %c0_i32_0 : i32, i32
  }
  func.func @transform_6(%arg0: i32, %arg1: i32) -> (i32, i32, i32, i32) {
    %c0_i32 = arith.constant 0 : i32
    %c0_i32_0 = arith.constant 0 : i32
    %c0_i32_1 = arith.constant 0 : i32
    %c0_i32_2 = arith.constant 0 : i32
    %c0_i32_3 = arith.constant 0 : i32
    return %c0_i32, %c0_i32_0, %c0_i32_1, %c0_i32_2 : i32, i32, i32, i32
  }
  func.func @transform_7(%arg0: i32, %arg1: i32) -> (i32, i32) {
    %c0_i32 = arith.constant 0 : i32
    %c0_i32_0 = arith.constant 0 : i32
    %c0_i32_1 = arith.constant 0 : i32
    return %c0_i32, %c0_i32_0 : i32, i32
  }
  func.func @transform_8(%arg0: i32, %arg1: i32) -> (i32, i32) {
    %c0_i32 = arith.constant 0 : i32
    %c0_i32_0 = arith.constant 0 : i32
    %c0_i32_1 = arith.constant 0 : i32
    return %c0_i32, %c0_i32_0 : i32, i32
  }
  func.func @transform_9(%arg0: i32, %arg1: i32) -> (i32, i32) {
    %c0_i32 = arith.constant 0 : i32
    %c0_i32_0 = arith.constant 0 : i32
    %c0_i32_1 = arith.constant 0 : i32
    return %c0_i32, %c0_i32_0 : i32, i32
  }
  func.func @transform_10(%arg0: i32, %arg1: i32) -> (i32, i32) {
    %c0_i32 = arith.constant 0 : i32
    %c0_i32_0 = arith.constant 0 : i32
    %c0_i32_1 = arith.constant 0 : i32
    return %c0_i32, %c0_i32_0 : i32, i32
  }
  func.func @transform_11(%arg0: i32, %arg1: i32) -> (i32, i32) {
    %c0_i32 = arith.constant 0 : i32
    %c0_i32_0 = arith.constant 0 : i32
    %c0_i32_1 = arith.constant 0 : i32
    return %c0_i32, %c0_i32_0 : i32, i32
  }
  func.func @transform_12(%arg0: i32, %arg1: i32) -> (i32, i32, i32, i32) {
    %c0_i32 = arith.constant 0 : i32
    %c0_i32_0 = arith.constant 0 : i32
    %c0_i32_1 = arith.constant 0 : i32
    return %arg0, %arg1, %c0_i32, %c0_i32_0 : i32, i32, i32, i32
  }
}

</mosaic_0001>

<bundles_post_ra>
// kernel: tpu_custom_call.1
= control target key start
LH: loop header
LB: loop body
LE: loop exit
PB: predicated region body
PF: predicated region fallthrough
CT: control target
= control target key end

     0   :  { %s6235_s0 = inlined_call_operand.hbm [shape: f32[2,16,16,32], index: 0, kind: input, shape index: {}]   ;;  %s6236_s1 = inlined_call_operand.hbm [shape: f32[2,16,16,32], index: 1, kind: input, shape index: {}]   ;;  %s6237_s2 = inlined_call_operand.hbm [shape: f32[2,16,16,32], index: 2, kind: input, shape index: {}]   ;;  %s6238_s3 = inlined_call_operand.vmem [shape: f32[32,8], index: 3, kind: input, shape index: {}]   ;;  %s6239_s4 = inlined_call_operand.vmem [shape: f32[1,8], index: 4, kind: input, shape index: {}]   ;;  %s6240_s5 = inlined_call_operand.vmem [shape: f32[1,8], index: 5, kind: input, shape index: {}]   ;;  %s6241_s6 = inlined_call_operand.hbm [shape: f32[3,3,8,8], index: 6, kind: input, shape index: {}]   ;;  %s6242_s7 = inlined_call_operand.vmem [shape: f32[1,8], index: 7, kind: input, shape index: {}]   ;;  %s6243_s8 = inlined_call_operand.vmem [shape: f32[1,8], index: 8, kind: input, shape index: {}]   ;;  %s6244_s9 = inlined_call_operand.vmem [shape: f32[8,32], index: 9, kind: input, shape index: {}]   ;;  %s6245_s10 = inlined_call_operand.vmem [shape: f32[1,32], index: 10, kind: input, shape index: {}]   ;;  %s6246_s11 = inlined_call_operand.vmem [shape: f32[1,32], index: 11, kind: input, shape index: {}]   ;;  %s6247_s12 = inlined_call_operand.hbm [shape: f32[2,16,16,32], index: 12, kind: output, shape index: {}]  }
   0x1   :  { %6275 = sst [smem:[#allocation33_spill]] %s6235_s0 }
   0x2   :  { %6276 = sst [smem:[#allocation34_spill]] %s6236_s1 }
   0x3   :  { %6277 = sst [smem:[#allocation35_spill]] %s6237_s2 }
   0x4   :  { %6278 = sst [smem:[#allocation36_spill]] %s6238_s3 }
   0x5   :  { %6279 = sst [smem:[#allocation37_spill]] %s6239_s4 }
   0x6   :  { %6280 = sst [smem:[#allocation38_spill]] %s6240_s5 }
   0x7   :  { %6281 = sst [smem:[#allocation39_spill]] %s6241_s6 }
   0x8   :  { %6282 = sst [smem:[#allocation40_spill]] %s6242_s7 }
   0x9   :  { %6283 = sst [smem:[#allocation41_spill]] %s6243_s8 }
   0xa   :  { %6284 = sst [smem:[#allocation42_spill]] %s6244_s9 }
   0xb   :  { %6285 = sst [smem:[#allocation43_spill]] %s6245_s10 }
   0xc   :  { %6286 = sst [smem:[#allocation44_spill]] %s6246_s11 }
   0xd   :  { %6287 = sst [smem:[#allocation45_spill]] %s6247_s12 }
   0xe   :  { %17 = vsyncpa [#allocation4], 0 }
   0xf   :  { %19 = vsyncpa [#allocation4 + $0x1], 0 }
  0x10   :  { %20 = vsyncpa [#allocation7], 0 }
  0x11   :  { %22 = vsyncpa [#allocation7 + $0x1], 0 }
  0x12   :  { %23 = vsyncpa [#allocation10], 0 }
  0x13   :  { %24 = vsyncpa [#allocation5], 0 }
  0x14   :  { %26 = vsyncpa [#allocation5 + $0x1], 0  ;;  %s5040_s21 = smov 0   ;;  %s5042_s22 = smov 0  }
  0x15   :  { %s5044_s23 = smov 0   ;;  %s5046_s24 = smov 0  }
  0x16   :  { %s5048_s25 = smov 0   ;;  %s5050_s26 = smov 0  }
  0x17   :  { %s5052_s27 = smov 0   ;;  %s5054_s28 = smov 0  }
  0x18   :  { %s5056_s29 = smov 0   ;;  %s5058_s30 = smov 0  }
  0x19   :  { %s5060_s13 = smov 0   ;;  %s5062_s14 = smov 0  }
  0x1a   :  { %s5064_s15 = smov 0   ;;  %s5066_s16 = smov 0  }
  0x1b LB: > { %6288 = sst [smem:[#allocation17_spill]] %s4911_s21  ;;  %s41_s17 = sadd.s32 1, %s4955_s14  ;;  %s4963_s16 = sphi %s5066_s16, %s32_s16   ;;  %s4959_s15 = sphi %s5064_s15, %s6373_s15   ;;  %s4955_s14 = sphi %s5062_s14, %s6372_s14   ;;  %s4951_s13 = sphi %s5060_s13, %s6371_s13   ;;  %s4947_s30 = sphi %s5058_s30, %s6370_s30   ;;  %s4943_s29 = sphi %s5056_s29, %s6369_s29   ;;  %s4939_s28 = sphi %s5054_s28, %s6378_s28   ;;  %s4935_s27 = sphi %s5052_s27, %s6377_s27   ;;  %s4931_s26 = sphi %s5050_s26, %s6367_s26   ;;  %s4927_s25 = sphi %s5048_s25, %s6376_s25   ;;  %s4923_s24 = sphi %s5046_s24, %s6375_s24   ;;  %s4919_s23 = sphi %s5044_s23, %s6374_s23   ;;  %s4915_s22 = sphi %s5042_s22, %s6365_s22   ;;  %s4911_s21 = sphi %s5040_s21, %s6364_s21  }
  0x1c   : > { %6289 = sst [smem:[#allocation18_spill]] %s4915_s22  ;;  %s44_s18 = sadd.s32 1, %s4959_s15 }
  0x1d   : > { %6290 = sst [smem:[#allocation19_spill]] %s4919_s23  ;;  %p42_p0 = scmp.ge.s32.totalorder %s41_s17, 2 }
  0x1e   : > { %6291 = sst [smem:[#allocation20_spill]] %s4931_s26  ;;  %p6260_p1 = scmp.eq.s32.totalorder %s4963_s16, 0 }
  0x1f   : > { %6292 = sst [smem:[#allocation21_spill]] %s4943_s29  ;;  %s3639_s19 = sshll.u32 %s4955_s14, 3 }
  0x20   : > { %6293 = sst [smem:[#allocation22_spill]] %s4947_s30  ;;  %s89_s20 = sadd.s32 1, %s4931_s26 }
  0x21   : > { %6294 = sst [smem:[#allocation23_spill]] %s4951_s13  ;;  %s6380_s17 = smov (%p42_p0, %s41_s17), 0 }
  0x22   : > { %6295 = sst [smem:[#allocation24_spill]] %s4955_s14  ;;  %s6382_s18 = smov (!%p42_p0, %s44_s18), %s4959_s15 }
  0x23   : > { %6296 = sst [smem:[#allocation25_spill]] %s4959_s15  ;;  %s49_s12 = ssub.s32 %s4955_s14, %s6380_s17 }
  0x24   : > { %6297 = sst [smem:[#allocation26_spill]] %s6380_s17  ;;  %s3640_s13 = sadd.s32 4294967295, %s3639_s19 }
  0x25   : > { %p46_p2 = scmp.ge.s32.totalorder %s6382_s18, 2  ;;  %p78_p3 = scmp.gt.s32.totalorder %s3640_s13, 0 }
  0x26   : > { %s3641_s11 = sshll.u32 %s6380_s17, 3  ;;  %p96_p4 = scmp.ne.s32.totalorder %s4931_s26, %s4927_s25 }
  0x27   : > { %s6384_s18 = smov (%p46_p2, %s6382_s18), 0  ;;  %s6386_s13 = smov (!%p78_p3, %s3640_s13), 0 }
  0x28   : > { %6298 = sst [smem:[#allocation27_spill]] %s6384_s18  ;;  %s5127_s10 = ssub.s32 %s4959_s15, %s6384_s18 }
  0x29   : > { %6299 = sst [smem:[#allocation28_spill]] %s5127_s10  ;;  %s3642_s8 = sadd.s32 4294967295, %s3641_s11 }
  0x2a   : > { %s5130_s7 = sor.u32 %s49_s12, %s5127_s10  ;;  %p82_p5 = scmp.gt.s32.totalorder %s3642_s8, 0 }
  0x2b   : > { %p5135_p7 = por %p96_p4, %p6260_p1  ;;  %p102_p8 = scmp.ne.s32.totalorder %s4927_s25, %s4923_s24 }
  0x2c   : > { %s6388_s8 = smov (!%p82_p5, %s3642_s8), 0  ;;  %s5141_s18 = sadd.s32 8, %s3639_s19 }
  0x2d   : > { %6301 = sst [smem:[#allocation29_spill]] %s5141_s18  ;;  %s85_s9 = ssub.s32 %s6386_s13, %s6388_s8 }
  0x2e   : > { %s86_s5 = sor.u32 %s85_s9, %s5127_s10  ;;  %s5145_s12 = sadd.s32 8, %s3641_s11 }
  0x2f   : > { %p87_p10 = scmp.eq.s32.totalorder %s86_s5, 0  ;;  %p6259_p12 = scmp.lt.s32.totalorder %s4963_s16, 4 }
  0x30   : > { %s5153_s30 = sshll.u32 %s4959_s15, 5  ;;  %s440_s3 = sand.u32 1, %s4963_s16  }
  0x31   : > { %s5149_s4 = scalar_select %p87_p10, %s4931_s26, %s89_s20  }
  0x32   : > { %s442_s19 = sand.u32 1, %s4931_s26   ;;  %s3656_s21 = sshll.u32 %s6386_s13, 1 }
  0x33   : > { %6302 = sst [smem:[#allocation30_spill]] %s5149_s4  ;;  %s3653_s2 = sshll.u32 %s442_s19, 4 }
  0x34   : > { %s454_s8 = sadd.s32 %s3656_s21, %s5153_s30  ;;  %s444_s9 = scalar_lea.vmem [#allocation6], %s3653_s2 }
  0x35   : > { %s3658_s22 = sshll.u32 %s454_s8, 7  ;;  %s457_s11 = sshll.u32 %s444_s9, 4  ;;  %s5163_s11 = int_to_ptr.vmem [resolvable:$true] %s457_s11 }
  0x36   : > { %s6303_s1 = sld [smem:[#allocation34_spill]]  ;;  %p5169_p13 = pnand %p6259_p12, %p5135_p7 }
  0x37   : > { %s5173_s2 = scalar_lea.sflag [#allocation7], %s440_s3 }
  0x38   : > { %p4689_p2 = pneg %p5169_p13 }
  0x3c   : > { %s5161_s23 = scalar_lea.hbm %s6303_s1, %s3658_s22  ;;  %s4692_s13 = scalar_lea.hbm %s6303_s1, 8192 }
  0x3d   : > { %s4687_s21 = scalar_lea.hbm %s5161_s23, 256  ;;  %p4693_p5 = scmp.lt.u32.totalorder %s5161_s23, %s6303_s1 }
  0x3e   : > { %p4688_p0 = scmp.ne.s32.totalorder %s5161_s23, %s4687_s21  ;;  %p4694_p7 = scmp.lt.u32.totalorder %s4692_s13, %s4687_s21 }
  0x3f   : > { %p4696_p11 = scmp.lt.u32.totalorder %s4687_s21, %s5161_s23 }
  0x40   : > { %p4690_p3 = pnand %p4689_p2, %p4688_p0  ;;  %p4695_p10 = por %p4694_p7, %p4693_p5 }
  0x42   : > { %p4691_p4 = pneg %p4690_p3  ;;  %p4697_p9 = por %p4696_p11, %p4695_p10 }
  0x44   : > { %p4698_p12 = pnand %p4697_p9, %p4691_p4 }
  0x46   : > { %4701 = shalt.err (!%p4698_p12)
}
  0x47   : > { %s4702_s3 = scalar_lea.vmem %s5163_s11, 256  ;;  %s4965_s20 = smov [#allocation6]  }
  0x48   : > { %p4703_p0 = scmp.ne.s32.totalorder %s5163_s11, %s4702_s3  ;;  %s4707_s19 = sshll.u32 %s4965_s20, 4  ;;  %s4708_s19 = int_to_ptr.vmem [resolvable:$false] %s4707_s19 }
  0x49   : > { %s4709_s8 = scalar_lea.vmem %s4708_s19, 512  ;;  %p4710_p6 = scmp.lt.s32.totalorder %s5163_s11, %s4708_s19 }
  0x4a   : > { %p4705_p3 = pnand %p4703_p0, %p4689_p2  ;;  %p4711_p5 = scmp.lt.s32.totalorder %s4709_s8, %s4702_s3 }
  0x4c   : > { %p4706_p1 = pneg %p4705_p3  ;;  %p4712_p7 = por %p4711_p5, %p4710_p6 }
  0x4e   : > { %p4713_p11 = pnand %p4712_p7, %p4706_p1 }
  0x50   : > { %4716 = shalt.err (!%p4713_p11)
}
  0x51   : > { %s6261_s9 = smov 128   ;;  %s6263_s21 = smov 8  }
  0x52   : > { %4557 = dma.hbm_to_vmem [thread:$0]  (!%p5169_p13), %s5161_s23, 256, %s5163_s11, %s5173_s2, %s6261_s9, %s6261_s9, %s6263_s21  }
  0x53   : > { %s5205_s10 = sadd.s32 4294967295, %s4963_s16   ;;  %p3645_p1 = scmp.ge.s32.totalorder %s4963_s16, 1 }
  0x54   : > { %p6265_p6 = scmp.eq.s32.totalorder %s5205_s10, 0  ;;  %p366_p12 = scmp.lt.s32.totalorder %s4963_s16, 5 }
  0x55   : > { %s4968_s23 = smov [#allocation9]   ;;  %s3638_s24 = sadd.s32 4294967294, %s4963_s16  }
  0x56   : > { %p5216_p2 = por %p102_p8, %p6265_p6  ;;  %p5220_p4 = pnand %p3645_p1, %p366_p12 }
  0x57   : > { %s387_s11 = sshll.u32 %s4968_s23, 4  ;;  %s53_s17 = sadd.s32 1, %s4943_s29  ;;  %s388_s11 = int_to_ptr.vmem [resolvable:$true] %s387_s11 }
  0x58   : > { %s6305_s22 = scalar_select %p5216_p2, 1, 0 }
  0x59   : > { %s6306_s5 = scalar_select %p5220_p4, 1, 0 }
  0x5a   : > { %p4547_p13 = pneg %p5220_p4  ;;  %s6308_s6 = sld [smem:[#allocation39_spill]] }
  0x5c   : > { %p5228_p10 = pnand %p4547_p13, %p6265_p6 }
  0x5e   : > { %p4719_p0 = pneg %p5228_p10 }
  0x60   : > { %s4717_s20 = scalar_lea.hbm %s6308_s6, 1152 }
  0x61   : > { %p4718_p8 = scmp.ne.s32.totalorder %s6308_s6, %s4717_s20  ;;  %p4724_p7 = scmp.lt.u32.totalorder %s4717_s20, %s6308_s6 }
  0x63   : > { %p4720_p3 = pnand %p4719_p0, %p4718_p8 }
  0x65   : > { %p4721_p5 = pneg %p4720_p3 }
  0x67   : > { %p4726_p11 = pnand %p4724_p7, %p4721_p5 }
  0x69   : > { %4729 = shalt.err (!%p4726_p11)
}
  0x6a   : > { %s4730_s21 = scalar_lea.vmem %s388_s11, 1152  ;;  %p4738_p9 = scmp.lt.s32.totalorder %s388_s11, %s388_s11 }
  0x6b   : > { %p4731_p1 = scmp.ne.s32.totalorder %s388_s11, %s4730_s21  ;;  %p4739_p6 = scmp.lt.s32.totalorder %s4730_s21, %s4730_s21 }
  0x6d   : > { %p4733_p12 = pnand %p4731_p1, %p4719_p0  ;;  %p4740_p2 = por %p4739_p6, %p4738_p9 }
  0x6f   : > { %p4734_p13 = pneg %p4733_p12 }
  0x71   : > { %p4741_p4 = pnand %p4740_p2, %p4734_p13 }
  0x73   : > { %4744 = shalt.err (!%p4741_p4)
}
  0x74   : > { %s6309_s18 = smov 8   ;;  %s6310_s3 = smov 128  }
  0x75   : > { %4550 = dma.hbm_to_vmem [thread:$0]  (!%p5228_p10), %s6308_s6, 1152, %s388_s11, [#allocation10], %s6310_s3, %s6310_s3, %s6309_s18  }
  0x76   : > { %p6311_p6 = scmp.eq.s32.totalorder %s5130_s7, 0  ;;  %p60_p9 = scmp.ne.s32.totalorder %s4943_s29, %s4939_s28 }
  0x77   : > { %p66_p2 = scmp.ne.s32.totalorder %s4939_s28, %s4935_s27  ;;  %p359_p4 = scmp.eq.s32.totalorder %s3638_s24, 3 }
  0x78   : > { %s5256_s9 = scalar_select %p6311_p6, %s4943_s29, %s53_s17  }
  0x79   : > { %s416_s21 = sand.u32 1, %s4943_s29   ;;  %p6313_p8 = scmp.eq.s32.totalorder %s4963_s16, 0 }
  0x7a   : > { %6312 = sst [smem:[#allocation31_spill]] %s5256_s9  ;;  %p6314_p3 = scmp.eq.s32.totalorder %s5205_s10, 0 }
  0x7b   : > { %p62_p0 = por %p6313_p8, %p60_p9  ;;  %p6316_p7 = scmp.eq.s32.totalorder %s5205_s10, 3 }
  0x7c   : > { %p5267_p5 = por %p6314_p3, %p66_p2  ;;  %p5277_p10 = por %p359_p4, %p66_p2 }
  0x7d   : > { %p5273_p11 = por %p6316_p7, %p60_p9  ;;  %s3648_s11 = sshll.u32 %s416_s21, 7 }
  0x7e   : > { %s6318_s7 = scalar_select %p5277_p10, 1, 0 }
  0x7f   : > { %s6317_s20 = scalar_select %p5273_p11, 1, 0 }
  0x80   : > { %6319 = sst [smem:[#allocation32_spill]] %s6318_s7  ;;  %s3863_s17 = sshll.u32 %s4955_s14, 4 }
  0x81   : > { %s427_s24 = sadd.s32 %s3863_s17, %s5153_s30  ;;  %s420_s23 = scalar_lea.vmem [#allocation3], %s3648_s11 }
  0x82   : > { %s430_s19 = sshll.u32 %s420_s23, 4  ;;  %s3652_s8 = sshll.u32 %s427_s24, 7  ;;  %s5283_s19 = int_to_ptr.vmem [resolvable:$true] %s430_s19 }
  0x83   : > { %s6320_s0 = sld [smem:[#allocation33_spill]]  ;;  %p6321_p1 = scmp.lt.s32.totalorder %s4963_s16, 4 }
  0x84   : > { %s5296_s11 = scalar_lea.sflag [#allocation4], %s416_s21 }
  0x85   : > { %p5292_p12 = pnand %p6321_p1, %p62_p0 }
  0x87   : > { %p4747_p6 = pneg %p5292_p12 }
  0x89   : > { %s5288_s15 = scalar_lea.hbm %s6320_s0, %s3652_s8  ;;  %s4750_s24 = scalar_lea.hbm %s6320_s0, 8192 }
  0x8a   : > { %s4745_s17 = scalar_lea.hbm %s5288_s15, 2048  ;;  %p4751_p4 = scmp.lt.u32.totalorder %s5288_s15, %s6320_s0 }
  0x8b   : > { %p4746_p13 = scmp.ne.s32.totalorder %s5288_s15, %s4745_s17  ;;  %p4752_p8 = scmp.lt.u32.totalorder %s4750_s24, %s4745_s17 }
  0x8c   : > { %p4754_p3 = scmp.lt.u32.totalorder %s4745_s17, %s5288_s15 }
  0x8d   : > { %p4748_p9 = pnand %p4747_p6, %p4746_p13  ;;  %p4753_p0 = por %p4752_p8, %p4751_p4 }
  0x8f   : > { %p4749_p2 = pneg %p4748_p9  ;;  %p4755_p7 = por %p4754_p3, %p4753_p0 }
  0x91   : > { %p4756_p1 = pnand %p4755_p7, %p4749_p2 }
  0x93   : > { %4759 = shalt.err (!%p4756_p1)
}
  0x94   : > { %s4760_s21 = scalar_lea.vmem %s5283_s19, 2048  ;;  %s4969_s1 = smov [#allocation3]  }
  0x95   : > { %p4761_p13 = scmp.ne.s32.totalorder %s5283_s19, %s4760_s21  ;;  %s4765_s6 = sshll.u32 %s4969_s1, 4  ;;  %s4766_s6 = int_to_ptr.vmem [resolvable:$false] %s4765_s6 }
  0x96   : > { %s4767_s23 = scalar_lea.vmem %s4766_s6, 4096  ;;  %p4768_p11 = scmp.lt.s32.totalorder %s5283_s19, %s4766_s6 }
  0x97   : > { %p4763_p9 = pnand %p4761_p13, %p4747_p6  ;;  %p4769_p4 = scmp.lt.s32.totalorder %s4767_s23, %s4760_s21 }
  0x99   : > { %p4764_p10 = pneg %p4763_p9  ;;  %p4770_p8 = por %p4769_p4, %p4768_p11 }
  0x9b   : > { %p4771_p0 = pnand %p4770_p8, %p4764_p10 }
  0x9d   : > { %4774 = shalt.err (!%p4771_p0)
}
  0x9e   : > { %s6323_s17 = sld [smem:[#allocation19_spill]]  ;;  %s6324_s24 = sld [smem:[#allocation29_spill]] }
  0x9f   : > { %s6325_s8 = sld [smem:[#allocation18_spill]]  ;;  %s6326_s1 = sld [smem:[#allocation17_spill]] }
  0xa0   : > { %s6327_s21 = sld [smem:[#allocation28_spill]]  ;;  %p6329_p10 = scmp.lt.s32.totalorder %s5145_s12, 15 }
  0xa1   : > { %4554 = dma.hbm_to_vmem [thread:$0]  (!%p5292_p12), %s5288_s15, 2048, %s5283_s19, %s5296_s11, %s6310_s3, %s6310_s3, %s6309_s18  }
  0xa2   : > { %s6392_s12 = smov (!%p6329_p10, %s5145_s12), 15  ;;  %p6330_p3 = scmp.eq.s32.totalorder %s4963_s16, 0 }
  0xa3   : > { %p6331_p13 = scmp.eq.s32.totalorder %s5205_s10, 0  ;;  %s6333_s26 = sld [smem:[#allocation35_spill]] }
  0xa4   : > { %s125_s9 = sadd.s32 1, %s6323_s17  ;;  %p6328_p11 = scmp.lt.s32.totalorder %s6324_s24, 15 }
  0xa5   : > { %p132_p6 = scmp.ne.s32.totalorder %s6323_s17, %s6325_s8  ;;  %p138_p2 = scmp.ne.s32.totalorder %s6325_s8, %s6326_s1 }
  0xa6   : > { %s6390_s24 = smov (!%p6328_p11, %s6324_s24), 15  ;;  %s469_s23 = sand.u32 1, %s6323_s17  }
  0xa7   : > { %s121_s6 = ssub.s32 %s6390_s24, %s6392_s12  ;;  %p134_p7 = por %p132_p6, %p6330_p3 }
  0xa8   : > { %s122_s0 = sor.u32 %s121_s6, %s6327_s21  ;;  %p5344_p9 = por %p138_p2, %p6331_p13 }
  0xa9   : > { %p123_p1 = scmp.eq.s32.totalorder %s122_s0, 0  ;;  %s3659_s15 = sshll.u32 %s469_s23, 4 }
  0xaa   : > { %s6332_s14 = scalar_select %p5344_p9, 1, 0 }
  0xab   : > { %s3661_s19 = sshll.u32 %s6390_s24, 1  ;;  %s6394_s17 = smov (!%p123_p1, %s6323_s17), %s125_s9 }
  0xac   : > { %s481_s11 = sadd.s32 %s3661_s19, %s5153_s30  ;;  %s471_s4 = scalar_lea.vmem [#allocation8], %s3659_s15 }
  0xad   : > { %s3663_s29 = sshll.u32 %s481_s11, 7  ;;  %s484_s8 = sshll.u32 %s471_s4, 4  ;;  %s5357_s8 = int_to_ptr.vmem [resolvable:$true] %s484_s8 }
  0xae   : > { %s6334_s7 = smov %s6333_s26  ;;  %s5355_s21 = scalar_lea.hbm %s6333_s26, %s3663_s29 }
  0xaf   : > { %p6335_p12 = scmp.lt.s32.totalorder %s4963_s16, 4  ;;  %s4775_s30 = scalar_lea.hbm %s5355_s21, 256 }
  0xb0   : > { %p4776_p8 = scmp.ne.s32.totalorder %s5355_s21, %s4775_s30  ;;  %s4780_s29 = scalar_lea.hbm %s6334_s7, 8192 }
  0xb1   : > { %p5361_p4 = pnand %p6335_p12, %p134_p7  ;;  %p4781_p6 = scmp.lt.u32.totalorder %s5355_s21, %s6334_s7 }
  0xb2   : > { %p4782_p2 = scmp.lt.u32.totalorder %s4780_s29, %s4775_s30  ;;  %p4784_p7 = scmp.lt.u32.totalorder %s4775_s30, %s5355_s21 }
  0xb3   : > { %p4777_p0 = pneg %p5361_p4 }
  0xb4   : > { %p4783_p3 = por %p4782_p2, %p4781_p6 }
  0xb5   : > { %p4778_p11 = pnand %p4777_p0, %p4776_p8 }
  0xb6   : > { %p4785_p1 = por %p4784_p7, %p4783_p3 }
  0xb7   : > { %p4779_p10 = pneg %p4778_p11 }
  0xb9   : > { %p4786_p13 = pnand %p4785_p1, %p4779_p10 }
  0xbb   : > { %4789 = shalt.err (!%p4786_p13)
}
  0xbc   : > { %s4790_s6 = scalar_lea.vmem %s5357_s8, 256  ;;  %s4970_s23 = smov [#allocation8]  }
  0xbd   : > { %p4791_p12 = scmp.ne.s32.totalorder %s5357_s8, %s4790_s6  ;;  %s4795_s15 = sshll.u32 %s4970_s23, 4  ;;  %s4796_s15 = int_to_ptr.vmem [resolvable:$false] %s4795_s15 }
  0xbe   : > { %s4797_s19 = scalar_lea.vmem %s4796_s15, 512  ;;  %p4798_p9 = scmp.lt.s32.totalorder %s5357_s8, %s4796_s15 }
  0xbf   : > { %p4793_p8 = pnand %p4791_p12, %p4777_p0  ;;  %p4799_p6 = scmp.lt.s32.totalorder %s4797_s19, %s4790_s6 }
  0xc1   : > { %p4794_p11 = pneg %p4793_p8  ;;  %p4800_p2 = por %p4799_p6, %p4798_p9 }
  0xc3   : > { %p4801_p3 = pnand %p4800_p2, %p4794_p11 }
  0xc5   : > { %4804 = shalt.err (!%p4801_p3)
}
  0xc6   : > { %4560 = dma.hbm_to_vmem [thread:$0]  (!%p5361_p4), %s5355_s21, 256, %s5357_s8, %s5173_s2, %s6310_s3, %s6310_s3, %s6309_s18  }
  0xc7   : > { %p6337_p0 = scmp.ne.s32.totalorder %s6306_s5, 0 }
  0xc8   : > { %s5397_s11 = sand.u32 (!%p6337_p0), 1, %s4939_s28  }
  0xc9   : > { %496 = sbr.rel (%p6337_p0) target bundleno = 1119 (0x45f), region = 68  ;;  %s3665_s1 = sshll.u32 (!%p6337_p0), %s5397_s11, 7 }
  0xca   : > { %s499_s12 = scalar_lea.sflag (!%p6337_p0), [#allocation4], %s5397_s11  ;;  %s5403_s0 = scalar_lea.vmem (!%p6337_p0), [#allocation3], %s3665_s1 }
  0xd0   : > { %4890 = dma.done.wait (%p5267_p5), %s499_s12, 2048  }
  0xd1   : > { %4892 = vsyncadd (%p5267_p5), %s499_s12, 4294965248  ;;  %s507_s2 = sand.u32 1, %s5205_s10   ;;  %s509_s5 = sand.u32 1, %s4927_s25  }
  0xd2   : > { %s5411_s18 = sshll.u32 %s509_s5, 4  ;;  %s508_s3 = scalar_lea.sflag [#allocation7], %s507_s2 }
  0xd3   : > { %s511_s8 = scalar_lea.vmem [#allocation6], %s5411_s18  ;;  %p6338_p9 = scmp.ne.s32.totalorder %s6305_s22, 0 }
  0xd5   : > { %4894 = dma.done.wait (%p6338_p9), %s508_s3, 256  }
  0xd6   : > { %4896 = vsyncadd (%p6338_p9), %s508_s3, 4294967040  ;;  %s6339_s21 = sld [smem:[#allocation18_spill]]  ;;  %p6340_p5 = scmp.ne.s32.totalorder %s6332_s14, 0 }
  0xdc   : > { %s518_s30 = sand.u32 1, %s6339_s21  }
  0xdd   : > { %s5419_s13 = sshll.u32 %s518_s30, 4 }
  0xde   : > { %s520_s4 = scalar_lea.vmem [#allocation8], %s5419_s13 }
  0xdf   : > { %4898 = dma.done.wait (%p6340_p5), %s508_s3, 256  }
  0xe0   : > { %4900 = vsyncadd (%p6340_p5), %s508_s3, 4294967040  ;;  %p6341_p4 = scmp.eq.s32.totalorder %s5205_s10, 0 }
  0xe2   : > { %4902 = dma.done.wait (%p6341_p4), [#allocation10], 1152   ;;  %p6342_p10 = pmov %p6341_p4 }
  0xe3   : > { %vm605_vm0 = vcmask 261120   ;;  %s6343_s29 = sld [smem:[#allocation36_spill]]  ;;  %v585_v5 = vld [vmem:[%s5403_s0] sm:$0xff]  ;;  %v586_v8 = vld [vmem:[%s5403_s0 + $0x8] sm:$0xff]  ;;  %v587_v10 = vld [vmem:[%s5403_s0 + $0x10] sm:$0xff]  ;;  %vm1051_vm1 = vcmask 64512  }
  0xe4   : > { %4904 = vsyncadd (%p6342_p10), [#allocation10], 4294966144  ;;  %v862_v6 = vld [vmem:[%s511_s8] sm:$0xff]  ;;  %4075 = vmatprep.mubr.msk.f32.mxu0 %vm605_vm0, %v585_v5  ;;  %v863_v9 = vld [vmem:[%s511_s8 + $0x8] sm:$0xff]  ;;  %v4971_v26 = vmov 0.0   ;;  %s6345_s19 = sld [smem:[#allocation22_spill]] }
  0xe5   : > { %4107 = vmatprep.mubr.msk.f32.mxu1 %vm605_vm0, %v862_v6  ;;  %v957_v11 = vld [vmem:[%s520_s4] sm:$0xff]  ;;  %v588_v12 = vld [vmem:[%s5403_s0 + $0x18] sm:$0xff]  ;;  %v590_v14 = vld [vmem:[%s5403_s0 + $0x28] sm:$0xff]  ;;  %1058 = vst.msk [vmem:[#allocation2 + $0xc0] sm:$0xff] %vm1051_vm1, %v4971_v26  ;;  %s6346_s18 = sld [smem:[#allocation37_spill]]  ;;  %s6347_s21 = sld [smem:[#allocation38_spill]] }
  0xe6   : > { %v589_v13 = vld [vmem:[%s5403_s0 + $0x20] sm:$0xff]  ;;  %v958_v15 = vld [vmem:[%s520_s4 + $0x8] sm:$0xff]  ;;  %v591_v16 = vld [vmem:[%s5403_s0 + $0x30] sm:$0xff]  ;;  %1052 = vst.msk [vmem:[#allocation2] sm:$0xff] %vm1051_vm1, %v4971_v26  ;;  %s6352_s22 = sld [smem:[#allocation42_spill]]  ;;  %s6353_s24 = sld [smem:[#allocation40_spill]] }
  0xe7   : > { %v592_v17 = vld [vmem:[%s5403_s0 + $0x38] sm:$0xff]  ;;  %v593_v18 = vld [vmem:[%s5403_s0 + $0x40] sm:$0xff]  ;;  %v594_v19 = vld [vmem:[%s5403_s0 + $0x48] sm:$0xff]  ;;  %1053 = vst.msk [vmem:[#allocation2 + $0x20] sm:$0xff] %vm1051_vm1, %v4971_v26  ;;  %s6354_s14 = sld [smem:[#allocation41_spill]]  ;;  %s6079_s3 = scalar_lea.vmem [#allocation11], %s3665_s1 }
  0xe8   : > { %v595_v20 = vld [vmem:[%s5403_s0 + $0x50] sm:$0xff]  ;;  %v596_v21 = vld [vmem:[%s5403_s0 + $0x58] sm:$0xff]  ;;  %v597_v22 = vld [vmem:[%s5403_s0 + $0x60] sm:$0xff]  ;;  %1054 = vst.msk [vmem:[#allocation2 + $0x40] sm:$0xff] %vm1051_vm1, %v4971_v26  ;;  %s6357_s1 = sld [smem:[#allocation23_spill]]  ;;  %s3488_s13 = sshll.u32 %s6079_s3, 4  ;;  %s6153_s13 = int_to_ptr.vmem [resolvable:$true] %s3488_s13 }
  0xe9   : > { %s6344_s9 = smov %s6343_s29  ;;  %v601_v0 = vld [vmem:[%s6343_s29] sm:$0xff]  ;;  %v598_v23 = vld [vmem:[%s5403_s0 + $0x68] sm:$0xff]  ;;  %v599_v24 = vld [vmem:[%s5403_s0 + $0x70] sm:$0xff]  ;;  %1055 = vst.msk [vmem:[#allocation2 + $0x60] sm:$0xff] %vm1051_vm1, %v4971_v26  ;;  %s6358_s26 = sld [smem:[#allocation45_spill]] }
  0xea   : > { %v602_v1 = vld [vmem:[%s6344_s9 + $0x8] sm:$0xff]  ;;  %v603_v2 = vld [vmem:[%s6344_s9 + $0x10] sm:$0xff]  ;;  %v604_v4 = vld [vmem:[%s6344_s9 + $0x18] sm:$0xff]  ;;  %1056 = vst.msk [vmem:[#allocation2 + $0x80] sm:$0xff] %vm1051_vm1, %v4971_v26  ;;  %p861_p7 = scmp.eq.s32.totalorder %s6345_s19, 0  ;;  %p956_p1 = scmp.eq.s32.totalorder %s6345_s19, 1 }
  0xeb   : > { %v4381_v3 = vpack.c.bf16 %v602_v1, %v601_v0  ;;  %v4385_v7 = vpack.c.bf16 %v604_v4, %v603_v2  ;;  %v600_v25 = vld [vmem:[%s5403_s0 + $0x78] sm:$0xff]  ;;  %1057 = vst.msk [vmem:[#allocation2 + $0xa0] sm:$0xff] %vm1051_vm1, %v4971_v26  ;;  %1059 = vst.msk [vmem:[#allocation2 + $0xe0] sm:$0xff] %vm1051_vm1, %v4971_v26  ;;  %v1128_v27 = vld [vmem:[#allocation9 + $0x8] sm:$0xff]  ;;  %s3864_s8 = sshll.u32 %s6345_s19, 4  ;;  %p6360_p12 = scmp.ne.s32.totalorder %s6317_s20, 0 }
  0xec   : > { %1060 = vst.msk [vmem:[#allocation2 + $0x100] sm:$0xff] %vm1051_vm1, %v4971_v26  ;;  %1061 = vst.msk [vmem:[#allocation2 + $0x120] sm:$0xff] %vm1051_vm1, %v4971_v26  ;;  %v5506_v28 = vld [vmem:[#allocation9 + $0x18] sm:$0xff]  ;;  %v5510_v29 = vld [vmem:[#allocation9 + $0x20] sm:$0xff]  ;;  %s951_s12 = scalar_select %p861_p7, 1, 0 }
  0xed   : > { %4382 = vmatprep.subr.bf16.mxu0 %v4381_v3  ;;  %4390 = vmatprep.subr.bf16.mxu1 %v4381_v3  ;;  %1062 = vst.msk [vmem:[#allocation2 + $0x18] sm:$0xff] %vm1051_vm1, %v4971_v26  ;;  %1063 = vst.msk [vmem:[#allocation2 + $0x38] sm:$0xff] %vm1051_vm1, %v4971_v26  ;;  %v5513_v30 = vld [vmem:[#allocation9] sm:$0xff]  ;;  %s1046_s30 = scalar_select %p956_p1, 1, 0 }
  0xee   : > { %4384 = vmatpush3.bf16.msra.mxu0 %v4381_v3  ;;  %4392 = vmatpush3.bf16.msra.mxu1 %v4381_v3  ;;  %1064 = vst.msk [vmem:[#allocation2 + $0x58] sm:$0xff] %vm1051_vm1, %v4971_v26  ;;  %1065 = vst.msk [vmem:[#allocation2 + $0x78] sm:$0xff] %vm1051_vm1, %v4971_v26  ;;  %v5520_v31 = vld [vmem:[%s6346_s18] ss:$0 sm:$0xff]  ;;  %v952_v37 = vstv %s951_s12  ;;  %s6355_s12 = sld [smem:[#allocation43_spill]]  ;;  %s6356_s18 = sld [smem:[#allocation44_spill]] }
  0xef   : > { %4386 = vmatprep.subr.bf16.mxu0 %v4385_v7  ;;  %4394 = vmatprep.subr.bf16.mxu1 %v4385_v7  ;;  %1066 = vst.msk [vmem:[#allocation2 + $0x98] sm:$0xff] %vm1051_vm1, %v4971_v26  ;;  %1067 = vst.msk [vmem:[#allocation2 + $0xb8] sm:$0xff] %vm1051_vm1, %v4971_v26  ;;  %v5525_v33 = vld [vmem:[%s6347_s21] ss:$0 sm:$0xff]  ;;  %vm5534_vm2 = vcmp.eq.s32.totalorder %v952_v37, 1  ;;  %v1047_v1 = vstv %s1046_s30  ;;  %s3859_s21 = sshll.u32 %s6357_s1, 5  ;;  %s6359_s6 = smov %s6358_s26 }
  0xf0   : > { %1068 = vst.msk [vmem:[#allocation2 + $0xd8] sm:$0xff] %vm1051_vm1, %v4971_v26  ;;  %1069 = vst.msk [vmem:[#allocation2 + $0xf8] sm:$0xff] %vm1051_vm1, %v4971_v26  ;;  %vm5561_vm3 = vcmp.eq.s32.totalorder %v1047_v1, 1  ;;  %s3485_s19 = sadd.s32 %s3864_s8, %s3859_s21  ;;  %s4972_s23 = smov [#allocation11]  }
  0xf1   : > { %1070 = vst.msk [vmem:[#allocation2 + $0x118] sm:$0xff] %vm1051_vm1, %v4971_v26  ;;  %1071 = vst.msk [vmem:[#allocation2 + $0x138] sm:$0xff] %vm1051_vm1, %v4971_v26  ;;  %s3860_s30 = sshll.u32 %s3485_s19, 7 }
  0xf2   : > { %4388 = vmatpush3.bf16.msra.mxu0 %v4385_v7  ;;  %4396 = vmatpush3.bf16.msra.mxu1 %v4385_v7  ;;  %s6151_s29 = scalar_lea.hbm %s6358_s26, %s3860_s30 }
  0xf3   : > { %4398 = vmatprep.subr.bf16.mxu1 %v4381_v3  ;;  %4121 = vmatprep.subr.mxu0 %v1128_v27 }
  0xf5   : > { %4076 = vmatmul.mubr.msk.f32.vlgmr.msra.gmra.mrb[0].mxu0 %vm605_vm0, %v586_v8  ;;  %4108 = vmatmul.mubr.msk.f32.vlgmr.msra.gmra.mrb[0].mxu1 %vm605_vm0, %v863_v9 }
  0xf6   : > { %4078 = vmatprep.mubr.msk.f32.mxu0 %vm605_vm0, %v587_v10  ;;  %4400 = vmatpush3.bf16.msra.mxu1 %v4381_v3 }
  0xf7   : > { %4402 = vmatprep.subr.bf16.mxu1 %v4385_v7  ;;  %4118 = vmatprep.mubr.msk.f32.mxu1 %vm605_vm0, %v957_v11 }
  0xf8   : > { %4122 = vmatpush3.msra.mxu0 %v1128_v27 }
  0xf9   : > { %4079 = vmatmul.mubr.msk.f32.gmra.mrb[2].mxu0 %vm605_vm0, %v588_v12  ;;  %4147 = vmatprep.subr.mxu0 %v5513_v30 }
  0xfa   : > { %4081 = vmatprep.mubr.msk.f32.mxu0 %vm605_vm0, %v589_v13  ;;  %4404 = vmatpush3.bf16.msra.mxu1 %v4385_v7 }
  0xfb   : > { %4405 = vmatprep.subr.mxu1 %v5506_v28 }
  0xfd   : > { %4082 = vmatmul.mubr.msk.f32.gmra.mrb[4].mxu0 %vm605_vm0, %v590_v14  ;;  %4119 = vmatmul.mubr.msk.f32.vlgmr.msra.gmra.mrb[2].mxu1 %vm605_vm0, %v958_v15 }
  0xfe   : > { %4084 = vmatprep.mubr.msk.f32.mxu0 %vm605_vm0, %v591_v16  ;;  %4406 = vmatpush3.msra.mxu1 %v5506_v28 }
  0xff   : > { %4225 = vmatprep.subr.mxu1 %v5510_v29 }
 0x101   : > { %4085 = vmatmul.mubr.msk.f32.gmra.mrb[6].mxu0 %vm605_vm0, %v592_v17 }
 0x102   : > { %4087 = vmatprep.mubr.msk.f32.mxu0 %vm605_vm0, %v593_v18 }
 0x105   : > { %4088 = vmatmul.mubr.msk.f32.gmra.mrb[8].mxu0 %vm605_vm0, %v594_v19 }
 0x106   : > { %4090 = vmatprep.mubr.msk.f32.mxu0 %vm605_vm0, %v595_v20 }
 0x109   : > { %4091 = vmatmul.mubr.msk.f32.gmra.mrb[10].mxu0 %vm605_vm0, %v596_v21 }
 0x10a   : > { %4093 = vmatprep.mubr.msk.f32.mxu0 %vm605_vm0, %v597_v22 }
 0x10d   : > { %4094 = vmatmul.mubr.msk.f32.gmra.mrb[12].mxu0 %vm605_vm0, %v598_v23 }
 0x10e   : > { %4096 = vmatprep.mubr.msk.f32.mxu0 %vm605_vm0, %v599_v24 }
 0x111   : > { %4097 = vmatmul.mubr.msk.f32.gmra.mrb[14].mxu0 %vm605_vm0, %v600_v25 }
 0x1c8   : > { %v4077_v32 = vpop.f32.mrb[0].mxu0  ;;  %v4109_v34 = vpop.f32.mrb[0].mxu1 }
 0x1c9   : > { %v807_v35 = vmul.f32 %v4077_v32, %v5520_v31  ;;  %v946_v36 = vmul.f32 %v4109_v34, %v5520_v31  ;;  %v720_v38 = vpop.f32.mrb[1].mxu0  ;;  %v936_v39 = vpop.f32.mrb[1].mxu1  ;;  %v5579_v34 = vld [vmem:[#allocation9 + $0x10] sm:$0xff] }
 0x1ca   : > { %v806_v40 = vmul.f32 %v5520_v31, %v720_v38  ;;  %v945_v41 = vmul.f32 %v5520_v31, %v936_v39 }
 0x1cb   : > { %v830_v42 = vadd.f32 %v5525_v33, %v807_v35  ;;  %v948_v43 = vadd.f32 %v5525_v33, %v946_v36 }
 0x1cc   : > { %v829_v45 = vadd.f32 %v5525_v33, %v806_v40  ;;  %v947_v46 = vadd.f32 %v5525_v33, %v945_v41  ;;  %v4080_v47 = vpop.f32.mrb[2].mxu0 }
 0x1cd   : > { %v846_v48 = vmax.f32 %v830_v42, 0.0  ;;  %v950_v49 = vmax.f32 %v948_v43, 0.0  ;;  %v809_v50 = vmul.f32 %v4080_v47, %v5520_v31  ;;  %v730_v51 = vpop.f32.mrb[3].mxu0 }
 0x1ce   : > { %v845_v52 = vmax.f32 %v829_v45, 0.0  ;;  %v949_v53 = vmax.f32 %v947_v46, 0.0  ;;  %v808_v54 = vmul.f32 %v5520_v31, %v730_v51 }
 0x1cf   : > { %1076 = vst.msk [vmem:[#allocation2 + $0x30] sm:$0xff] %vm1051_vm1, %v846_v48  ;;  %v955_v55 = vsel %vm5534_vm2, 0.0, %v950_v49  ;;  %v832_v56 = vadd.f32 %v5525_v33, %v809_v50 }
 0x1d0   : > { %1073 = vst.msk [vmem:[#allocation2 + $0x10] sm:$0xff] %vm1051_vm1, %v955_v55  ;;  %1075 = vst.msk [vmem:[#allocation2 + $0x28] sm:$0xff] %vm1051_vm1, %v845_v52  ;;  %v954_v57 = vsel %vm5534_vm2, 0.0, %v949_v53  ;;  %v831_v58 = vadd.f32 %v5525_v33, %v808_v54  ;;  %v4083_v59 = vpop.f32.mrb[4].mxu0  ;;  %v4120_v60 = vpop.f32.mrb[2].mxu1 }
 0x1d1   : > { %1072 = vst.msk [vmem:[#allocation2 + $0x8] sm:$0xff] %vm1051_vm1, %v954_v57  ;;  %v848_v61 = vmax.f32 %v832_v56, 0.0  ;;  %v811_v62 = vmul.f32 %v4083_v59, %v5520_v31  ;;  %v740_v63 = vpop.f32.mrb[5].mxu0  ;;  %v1041_v0 = vmul.f32 %v4120_v60, %v5520_v31  ;;  %v1031_v2 = vpop.f32.mrb[3].mxu1 }
 0x1d2   : > { %v847_v3 = vmax.f32 %v831_v58, 0.0  ;;  %v810_v4 = vmul.f32 %v5520_v31, %v740_v63  ;;  %v1040_v5 = vmul.f32 %v5520_v31, %v1031_v2 }
 0x1d3   : > { %1078 = vst.msk [vmem:[#allocation2 + $0x50] sm:$0xff] %vm1051_vm1, %v848_v61  ;;  %v834_v6 = vadd.f32 %v5525_v33, %v811_v62  ;;  %v1043_v7 = vadd.f32 %v5525_v33, %v1041_v0 }
 0x1d4   : > { %1077 = vst.msk [vmem:[#allocation2 + $0x48] sm:$0xff] %vm1051_vm1, %v847_v3  ;;  %v833_v8 = vadd.f32 %v5525_v33, %v810_v4  ;;  %v4086_v9 = vpop.f32.mrb[6].mxu0  ;;  %v1042_v11 = vadd.f32 %v5525_v33, %v1040_v5 }
 0x1d5   : > { %v850_v12 = vmax.f32 %v834_v6, 0.0  ;;  %v813_v13 = vmul.f32 %v4086_v9, %v5520_v31  ;;  %v750_v14 = vpop.f32.mrb[7].mxu0  ;;  %v1045_v15 = vmax.f32 %v1043_v7, 0.0 }
 0x1d6   : > { %v849_v16 = vmax.f32 %v833_v8, 0.0  ;;  %v812_v17 = vmul.f32 %v5520_v31, %v750_v14  ;;  %v1044_v18 = vmax.f32 %v1042_v11, 0.0  ;;  %v5595_v44 = vld [vmem:[#allocation2 + $0x30] sm:$0xff] }
 0x1d7   : > { %1080 = vst.msk [vmem:[#allocation2 + $0x70] sm:$0xff] %vm1051_vm1, %v850_v12  ;;  %v836_v19 = vadd.f32 %v5525_v33, %v813_v13  ;;  %v1112_v20 = vld [vmem:[#allocation2 + $0x10] sm:$0xff]  ;;  %v1050_v21 = vsel %vm5561_vm3, 0.0, %v1045_v15  ;;  %v5584_v37 = vld [vmem:[#allocation2 + $0x28] sm:$0xff] }
 0x1d8   : > { %1079 = vst.msk [vmem:[#allocation2 + $0x68] sm:$0xff] %vm1051_vm1, %v849_v16  ;;  %v835_v22 = vadd.f32 %v5525_v33, %v812_v17  ;;  %v4089_v23 = vpop.f32.mrb[8].mxu0  ;;  %v1111_v24 = vld [vmem:[#allocation2 + $0x8] sm:$0xff]  ;;  %1093 = vst.msk [vmem:[#allocation2 + $0x130] sm:$0xff] %vm1051_vm1, %v1050_v21  ;;  %v1049_v25 = vsel %vm5561_vm3, 0.0, %v1044_v18 }
 0x1d9   : > { %v852_v26 = vmax.f32 %v836_v19, 0.0  ;;  %v815_v27 = vmul.f32 %v4089_v23, %v5520_v31  ;;  %v760_v32 = vpop.f32.mrb[9].mxu0  ;;  %4123 = vmatprep.mubr.msk.f32.mxu0 %vm1051_vm1, %v1111_v24  ;;  %1092 = vst.msk [vmem:[#allocation2 + $0x128] sm:$0xff] %vm1051_vm1, %v1049_v25  ;;  %v1094_v17 = vld [vmem:[#allocation2 + $0x7] sm:$0xff]  ;;  %v1095_v19 = vld [vmem:[#allocation2 + $0xf] sm:$0xff] }
 0x1da   : > { %v851_v35 = vmax.f32 %v835_v22, 0.0  ;;  %v814_v36 = vmul.f32 %v5520_v31, %v760_v32  ;;  %4124 = vmatmul.mubr.msk.f32.vlgmr.msra.gmra.mrb[16].mxu0 %vm1051_vm1, %v1112_v20  ;;  %v5609_v53 = vld [vmem:[#allocation2 + $0x50] sm:$0xff]  ;;  %v5697_v21 = vld [vmem:[#allocation2 + $0x27] sm:$0xff] }
 0x1db   : > { %1082 = vst.msk [vmem:[#allocation2 + $0x90] sm:$0xff] %vm1051_vm1, %v852_v26  ;;  %v838_v38 = vadd.f32 %v5525_v33, %v815_v27  ;;  %4126 = vmatprep.mubr.msk.f32.mxu0 %vm1051_vm1, %v5584_v37  ;;  %4148 = vmatpush3.msra.mxu0 %v5513_v30  ;;  %v5600_v30 = vld [vmem:[#allocation2 + $0x48] sm:$0xff]  ;;  %v2441_v20 = vld [vmem:[#allocation9 + $0x30] sm:$0xff] }
 0x1dc   : > { %1081 = vst.msk [vmem:[#allocation2 + $0x88] sm:$0xff] %vm1051_vm1, %v851_v35  ;;  %v837_v39 = vadd.f32 %v5525_v33, %v814_v36  ;;  %v4092_v40 = vpop.f32.mrb[10].mxu0  ;;  %4173 = vmatprep.subr.mxu0 %v5579_v34  ;;  %v5706_v22 = vld [vmem:[#allocation2 + $0x2f] sm:$0xff]  ;;  %v5713_v23 = vld [vmem:[#allocation2 + $0x47] sm:$0xff] }
 0x1dd   : > { %v854_v41 = vmax.f32 %v838_v38, 0.0  ;;  %v817_v42 = vmul.f32 %v4092_v40, %v5520_v31  ;;  %v770_v43 = vpop.f32.mrb[11].mxu0  ;;  %v5719_v24 = vld [vmem:[#allocation2 + $0x4f] sm:$0xff] }
 0x1de   : > { %v853_v45 = vmax.f32 %v837_v39, 0.0  ;;  %v816_v46 = vmul.f32 %v5520_v31, %v770_v43  ;;  %4127 = vmatmul.mubr.msk.f32.gmra.mrb[18].mxu0 %vm1051_vm1, %v5595_v44  ;;  %v5623_v63 = vld [vmem:[#allocation2 + $0x70] sm:$0xff] }
 0x1df   : > { %1084 = vst.msk [vmem:[#allocation2 + $0xb0] sm:$0xff] %vm1051_vm1, %v854_v41  ;;  %v840_v47 = vadd.f32 %v5525_v33, %v817_v42  ;;  %4129 = vmatprep.mubr.msk.f32.mxu0 %vm1051_vm1, %v5600_v30  ;;  %v5614_v56 = vld [vmem:[#allocation2 + $0x68] sm:$0xff]  ;;  %v2197_v40 = vld [vmem:[#allocation2 + $0x31] sm:$0xff] }
 0x1e0   : > { %1083 = vst.msk [vmem:[#allocation2 + $0xa8] sm:$0xff] %vm1051_vm1, %v853_v45  ;;  %v839_v48 = vadd.f32 %v5525_v33, %v816_v46  ;;  %v4095_v49 = vpop.f32.mrb[12].mxu0  ;;  %v5725_v25 = vld [vmem:[#allocation2 + $0x67] sm:$0xff]  ;;  %v5731_v26 = vld [vmem:[#allocation2 + $0x6f] sm:$0xff]  ;;  %v2668_v42 = vld [vmem:[#allocation9 + $0x38] sm:$0xff] }
 0x1e1   : > { %v856_v50 = vmax.f32 %v840_v47, 0.0  ;;  %v819_v51 = vmul.f32 %v4095_v49, %v5520_v31  ;;  %v780_v52 = vpop.f32.mrb[13].mxu0  ;;  %v1515_v38 = vld [vmem:[#allocation2 + $0x9] sm:$0xff]  ;;  %v1516_v41 = vld [vmem:[#allocation2 + $0x11] sm:$0xff] }
 0x1e2   : > { %v855_v54 = vmax.f32 %v839_v48, 0.0  ;;  %v818_v55 = vmul.f32 %v5520_v31, %v780_v52  ;;  %4130 = vmatmul.mubr.msk.f32.gmra.mrb[20].mxu0 %vm1051_vm1, %v5609_v53  ;;  %v5636_v6 = vld [vmem:[#allocation2 + $0x90] sm:$0xff] }
 0x1e3   : > { %1086 = vst.msk [vmem:[#allocation2 + $0xd0] sm:$0xff] %vm1051_vm1, %v856_v50  ;;  %v842_v57 = vadd.f32 %v5525_v33, %v819_v51  ;;  %4132 = vmatprep.mubr.msk.f32.mxu0 %vm1051_vm1, %v5614_v56  ;;  %v5628_v2 = vld [vmem:[#allocation2 + $0x88] sm:$0xff]  ;;  %v5800_v46 = vld [vmem:[#allocation2 + $0x71] sm:$0xff] }
 0x1e4   : > { %1085 = vst.msk [vmem:[#allocation2 + $0xc8] sm:$0xff] %vm1051_vm1, %v855_v54  ;;  %v841_v58 = vadd.f32 %v5525_v33, %v818_v55  ;;  %v4098_v59 = vpop.f32.mrb[14].mxu0  ;;  %v5737_v27 = vld [vmem:[#allocation2 + $0x87] sm:$0xff]  ;;  %v5743_v32 = vld [vmem:[#allocation2 + $0x8f] sm:$0xff] }
 0x1e5   : > { %v858_v60 = vmax.f32 %v842_v57, 0.0  ;;  %v821_v61 = vmul.f32 %v4098_v59, %v5520_v31  ;;  %v790_v62 = vpop.f32.mrb[15].mxu0  ;;  %v2196_v39 = vld [vmem:[#allocation2 + $0x29] sm:$0xff] }
 0x1e6   : > { %v857_v0 = vmax.f32 %v841_v58, 0.0  ;;  %v820_v1 = vmul.f32 %v5520_v31, %v790_v62  ;;  %4133 = vmatmul.mubr.msk.f32.gmra.mrb[22].mxu0 %vm1051_vm1, %v5623_v63  ;;  %v5654_v10 = vld [vmem:[#allocation2 + $0xb0] sm:$0xff]  ;;  %v2895_v58 = vld [vmem:[#allocation9 + $0x40] sm:$0xff] }
 0x1e7   : > { %1088 = vst.msk [vmem:[#allocation2 + $0xf0] sm:$0xff] %vm1051_vm1, %v858_v60  ;;  %v844_v3 = vadd.f32 %v5525_v33, %v821_v61  ;;  %4135 = vmatprep.mubr.msk.f32.mxu0 %vm1051_vm1, %v5628_v2  ;;  %v5640_v7 = vld [vmem:[#allocation2 + $0xa8] sm:$0xff]  ;;  %v5824_v49 = vld [vmem:[#allocation2 + $0xb1] sm:$0xff]  ;;  %v3167_v62 = vld [vmem:[%s6352_s22] sm:$0xff] }
 0x1e8   : > { %1087 = vst.msk [vmem:[#allocation2 + $0xe8] sm:$0xff] %vm1051_vm1, %v857_v0  ;;  %v843_v4 = vadd.f32 %v5525_v33, %v820_v1  ;;  %v2213_v33 = vld [vmem:[#allocation9 + $0x28] sm:$0xff]  ;;  %v2893_v61 = vld [vmem:[#allocation2 + $0x131] sm:$0xff] }
 0x1e9   : > { %v860_v5 = vmax.f32 %v844_v3, 0.0  ;;  %v5755_v35 = vld [vmem:[#allocation2 + $0xaf] sm:$0xff]  ;;  %v2438_v59 = vld [vmem:[#allocation2 + $0x127] sm:$0xff] }
 0x1ea   : > { %v859_v31 = vmax.f32 %v843_v4, 0.0  ;;  %4136 = vmatmul.mubr.msk.f32.gmra.mrb[24].mxu0 %vm1051_vm1, %v5636_v6  ;;  %v5783_v43 = vld [vmem:[#allocation2 + $0x49] sm:$0xff]  ;;  %v5836_v51 = vld [vmem:[#allocation2 + $0xd1] sm:$0xff] }
 0x1eb   : > { %1090 = vst.msk [vmem:[#allocation2 + $0x110] sm:$0xff] %vm1051_vm1, %v860_v5  ;;  %4138 = vmatprep.mubr.msk.f32.mxu0 %vm1051_vm1, %v5640_v7  ;;  %v5645_v8 = vld [vmem:[#allocation2 + $0xc7] sm:$0xff]  ;;  %v5647_v9 = vld [vmem:[#allocation2 + $0xcf] sm:$0xff] }
 0x1ec   : > { %1089 = vst.msk [vmem:[#allocation2 + $0x108] sm:$0xff] %vm1051_vm1, %v859_v31  ;;  %4216 = vmatprep.mubr.msk.f32.mxu1 %vm1051_vm1, %v5645_v8  ;;  %v5659_v11 = vld [vmem:[#allocation2 + $0xc8] sm:$0xff] }
 0x1ed   : > { %4217 = vmatmul.mubr.msk.f32.vlgmr.msra.gmra.mrb[4].mxu1 %vm1051_vm1, %v5647_v9  ;;  %v5793_v45 = vld [vmem:[#allocation2 + $0x69] sm:$0xff] }
 0x1ee   : > { %4226 = vmatpush3.msra.mxu1 %v5510_v29  ;;  %4139 = vmatmul.mubr.msk.f32.gmra.mrb[26].mxu0 %vm1051_vm1, %v5654_v10  ;;  %v5671_v29 = vld [vmem:[#allocation2 + $0xd0] sm:$0xff] }
 0x1ef   : > { %4141 = vmatprep.mubr.msk.f32.mxu0 %vm1051_vm1, %v5659_v11  ;;  %v5663_v12 = vld [vmem:[#allocation2 + $0xe7] sm:$0xff]  ;;  %v5665_v13 = vld [vmem:[#allocation2 + $0xef] sm:$0xff]  ;;  %4251 = vmatprep.subr.mxu1 %v2213_v33 }
 0x1f0   : > { %4219 = vmatprep.mubr.msk.f32.mxu1 %vm1051_vm1, %v5663_v12  ;;  %v5675_v14 = vld [vmem:[#allocation2 + $0xe8] sm:$0xff]  ;;  %v5687_v18 = vld [vmem:[#allocation2 + $0xf0] sm:$0xff] }
 0x1f1   : > { %4220 = vmatmul.mubr.msk.f32.gmra.mrb[6].mxu1 %vm1051_vm1, %v5665_v13  ;;  %v5804_v47 = vld [vmem:[#allocation2 + $0x89] sm:$0xff]  ;;  %v5848_v54 = vld [vmem:[#allocation2 + $0xf1] sm:$0xff] }
 0x1f2   : > { %4142 = vmatmul.mubr.msk.f32.gmra.mrb[28].mxu0 %vm1051_vm1, %v5671_v29  ;;  %v5816_v48 = vld [vmem:[#allocation2 + $0xa9] sm:$0xff]  ;;  %v5860_v57 = vld [vmem:[#allocation2 + $0x111] sm:$0xff] }
 0x1f3   : > { %4144 = vmatprep.mubr.msk.f32.mxu0 %vm1051_vm1, %v5675_v14  ;;  %v5679_v15 = vld [vmem:[#allocation2 + $0x107] sm:$0xff]  ;;  %v5681_v16 = vld [vmem:[#allocation2 + $0x10f] sm:$0xff] }
 0x1f4   : > { %4222 = vmatprep.mubr.msk.f32.mxu1 %vm1051_vm1, %v5679_v15  ;;  %v5765_v36 = vld [vmem:[#allocation2 + $0x108] sm:$0xff] }
 0x1f5   : > { %4223 = vmatmul.mubr.msk.f32.gmra.mrb[8].mxu1 %vm1051_vm1, %v5681_v16  ;;  %v5828_v50 = vld [vmem:[#allocation2 + $0xc9] sm:$0xff] }
 0x1f6   : > { %4145 = vmatmul.mubr.msk.f32.gmra.mrb[30].mxu0 %vm1051_vm1, %v5687_v18  ;;  %4227 = vmatprep.mubr.msk.f32.mxu1 %vm1051_vm1, %v5584_v37  ;;  %v5773_v37 = vld [vmem:[#allocation2 + $0x110] sm:$0xff] }
 0x1f7   : > { %4149 = vmatprep.mubr.msk.f32.mxu0 %vm1051_vm1, %v1094_v17  ;;  %v5840_v52 = vld [vmem:[#allocation2 + $0xe9] sm:$0xff] }
 0x1f8   : > { %v5852_v55 = vld [vmem:[#allocation2 + $0x109] sm:$0xff] }
 0x1f9   : > { %4228 = vmatmul.mubr.msk.f32.vlgmr.msra.gmra.mrb[10].mxu1 %vm1051_vm1, %v5595_v44  ;;  %v5788_v44 = vld [vmem:[#allocation2 + $0x51] sm:$0xff] }
 0x1fa   : > { %4252 = vmatpush3.msra.mxu1 %v2213_v33  ;;  %4150 = vmatmul.mubr.msk.f32.vlgmr.msra.gmra.mrb[16].mxu0 %vm1051_vm1, %v1095_v19  ;;  %v2439_v60 = vld [vmem:[#allocation2 + $0x12f] sm:$0xff] }
 0x1fb   : > { %4230 = vmatprep.mubr.msk.f32.mxu1 %vm1051_vm1, %v5600_v30  ;;  %4152 = vmatprep.mubr.msk.f32.mxu0 %vm1051_vm1, %v5697_v21 }
 0x1fc   : > { %4277 = vmatprep.subr.mxu1 %v2441_v20  ;;  %4174 = vmatpush3.msra.mxu0 %v5579_v34  ;;  %v5749_v34 = vld [vmem:[#allocation2 + $0xa7] sm:$0xff] }
 0x1fd   : > { %4231 = vmatmul.mubr.msk.f32.gmra.mrb[12].mxu1 %vm1051_vm1, %v5609_v53  ;;  %4199 = vmatprep.subr.mxu0 %v5506_v28 }
 0x1fe   : > { %4153 = vmatmul.mubr.msk.f32.gmra.mrb[18].mxu0 %vm1051_vm1, %v5706_v22  ;;  %4233 = vmatprep.mubr.msk.f32.mxu1 %vm1051_vm1, %v5614_v56 }
 0x1ff   : > { %4155 = vmatprep.mubr.msk.f32.mxu0 %vm1051_vm1, %v5713_v23 }
 0x201   : > { %4234 = vmatmul.mubr.msk.f32.gmra.mrb[14].mxu1 %vm1051_vm1, %v5623_v63 }
 0x202   : > { %4156 = vmatmul.mubr.msk.f32.gmra.mrb[20].mxu0 %vm1051_vm1, %v5719_v24  ;;  %4236 = vmatprep.mubr.msk.f32.mxu1 %vm1051_vm1, %v5628_v2 }
 0x203   : > { %4158 = vmatprep.mubr.msk.f32.mxu0 %vm1051_vm1, %v5725_v25 }
 0x205   : > { %4237 = vmatmul.mubr.msk.f32.gmra.mrb[16].mxu1 %vm1051_vm1, %v5636_v6 }
 0x206   : > { %4159 = vmatmul.mubr.msk.f32.gmra.mrb[22].mxu0 %vm1051_vm1, %v5731_v26  ;;  %4239 = vmatprep.mubr.msk.f32.mxu1 %vm1051_vm1, %v5640_v7 }
 0x207   : > { %4161 = vmatprep.mubr.msk.f32.mxu0 %vm1051_vm1, %v5737_v27 }
 0x209   : > { %4240 = vmatmul.mubr.msk.f32.gmra.mrb[18].mxu1 %vm1051_vm1, %v5654_v10 }
 0x20a   : > { %4162 = vmatmul.mubr.msk.f32.gmra.mrb[24].mxu0 %vm1051_vm1, %v5743_v32  ;;  %4242 = vmatprep.mubr.msk.f32.mxu1 %vm1051_vm1, %v5659_v11 }
 0x20b   : > { %4164 = vmatprep.mubr.msk.f32.mxu0 %vm1051_vm1, %v5749_v34 }
 0x20d   : > { %4243 = vmatmul.mubr.msk.f32.gmra.mrb[4].mxu1 %vm1051_vm1, %v5671_v29 }
 0x20e   : > { %4165 = vmatmul.mubr.msk.f32.gmra.mrb[26].mxu0 %vm1051_vm1, %v5755_v35  ;;  %4245 = vmatprep.mubr.msk.f32.mxu1 %vm1051_vm1, %v5675_v14 }
 0x20f   : > { %4167 = vmatprep.mubr.msk.f32.mxu0 %vm1051_vm1, %v5645_v8 }
 0x211   : > { %4246 = vmatmul.mubr.msk.f32.gmra.mrb[6].mxu1 %vm1051_vm1, %v5687_v18 }
 0x212   : > { %4168 = vmatmul.mubr.msk.f32.gmra.mrb[28].mxu0 %vm1051_vm1, %v5647_v9  ;;  %4248 = vmatprep.mubr.msk.f32.mxu1 %vm1051_vm1, %v5765_v36 }
 0x213   : > { %4170 = vmatprep.mubr.msk.f32.mxu0 %vm1051_vm1, %v5663_v12 }
 0x215   : > { %4249 = vmatmul.mubr.msk.f32.gmra.mrb[8].mxu1 %vm1051_vm1, %v5773_v37 }
 0x216   : > { %4171 = vmatmul.mubr.msk.f32.gmra.mrb[30].mxu0 %vm1051_vm1, %v5665_v13  ;;  %4253 = vmatprep.mubr.msk.f32.mxu1 %vm1051_vm1, %v2196_v39 }
 0x217   : > { %4175 = vmatprep.mubr.msk.f32.mxu0 %vm1051_vm1, %v1515_v38 }
 0x219   : > { %4254 = vmatmul.mubr.msk.f32.vlgmr.msra.gmra.mrb[10].mxu1 %vm1051_vm1, %v2197_v40 }
 0x21a   : > { %4278 = vmatpush3.msra.mxu1 %v2441_v20  ;;  %4176 = vmatmul.mubr.msk.f32.vlgmr.msra.gmra.mrb[16].mxu0 %vm1051_vm1, %v1516_v41 }
 0x21b   : > { %4256 = vmatprep.mubr.msk.f32.mxu1 %vm1051_vm1, %v5783_v43  ;;  %4178 = vmatprep.mubr.msk.f32.mxu0 %vm1051_vm1, %v2196_v39 }
 0x21c   : > { %4303 = vmatprep.subr.mxu1 %v2668_v42  ;;  %4200 = vmatpush3.msra.mxu0 %v5506_v28  ;;  %v5812_v28 = vld [vmem:[#allocation2 + $0x91] sm:$0xff] }
 0x21d   : > { %4257 = vmatmul.mubr.msk.f32.gmra.mrb[12].mxu1 %vm1051_vm1, %v5788_v44  ;;  %4355 = vmatprep.subr.mxu0 %v3167_v62 }
 0x21e   : > { %4179 = vmatmul.mubr.msk.f32.gmra.mrb[18].mxu0 %vm1051_vm1, %v2197_v40  ;;  %4259 = vmatprep.mubr.msk.f32.mxu1 %vm1051_vm1, %v5793_v45 }
 0x21f   : > { %4181 = vmatprep.mubr.msk.f32.mxu0 %vm1051_vm1, %v5783_v43 }
 0x221   : > { %4260 = vmatmul.mubr.msk.f32.gmra.mrb[14].mxu1 %vm1051_vm1, %v5800_v46 }
 0x222   : > { %4182 = vmatmul.mubr.msk.f32.gmra.mrb[20].mxu0 %vm1051_vm1, %v5788_v44  ;;  %4262 = vmatprep.mubr.msk.f32.mxu1 %vm1051_vm1, %v5804_v47 }
 0x223   : > { %4184 = vmatprep.mubr.msk.f32.mxu0 %vm1051_vm1, %v5793_v45 }
 0x225   : > { %4263 = vmatmul.mubr.msk.f32.gmra.mrb[16].mxu1 %vm1051_vm1, %v5812_v28 }
 0x226   : > { %4185 = vmatmul.mubr.msk.f32.gmra.mrb[22].mxu0 %vm1051_vm1, %v5800_v46  ;;  %4265 = vmatprep.mubr.msk.f32.mxu1 %vm1051_vm1, %v5816_v48 }
 0x227   : > { %4187 = vmatprep.mubr.msk.f32.mxu0 %vm1051_vm1, %v5804_v47 }
 0x229   : > { %4266 = vmatmul.mubr.msk.f32.gmra.mrb[18].mxu1 %vm1051_vm1, %v5824_v49 }
 0x22a   : > { %4188 = vmatmul.mubr.msk.f32.gmra.mrb[24].mxu0 %vm1051_vm1, %v5812_v28  ;;  %4268 = vmatprep.mubr.msk.f32.mxu1 %vm1051_vm1, %v5828_v50 }
 0x22b   : > { %4190 = vmatprep.mubr.msk.f32.mxu0 %vm1051_vm1, %v5816_v48 }
 0x22d   : > { %4269 = vmatmul.mubr.msk.f32.gmra.mrb[4].mxu1 %vm1051_vm1, %v5836_v51 }
 0x22e   : > { %4191 = vmatmul.mubr.msk.f32.gmra.mrb[26].mxu0 %vm1051_vm1, %v5824_v49  ;;  %4271 = vmatprep.mubr.msk.f32.mxu1 %vm1051_vm1, %v5840_v52 }
 0x22f   : > { %4193 = vmatprep.mubr.msk.f32.mxu0 %vm1051_vm1, %v5828_v50 }
 0x231   : > { %4272 = vmatmul.mubr.msk.f32.gmra.mrb[6].mxu1 %vm1051_vm1, %v5848_v54 }
 0x232   : > { %4194 = vmatmul.mubr.msk.f32.gmra.mrb[28].mxu0 %vm1051_vm1, %v5836_v51  ;;  %4274 = vmatprep.mubr.msk.f32.mxu1 %vm1051_vm1, %v5852_v55 }
 0x233   : > { %4196 = vmatprep.mubr.msk.f32.mxu0 %vm1051_vm1, %v5840_v52 }
 0x235   : > { %4275 = vmatmul.mubr.msk.f32.gmra.mrb[8].mxu1 %vm1051_vm1, %v5860_v57 }
 0x236   : > { %4197 = vmatmul.mubr.msk.f32.gmra.mrb[30].mxu0 %vm1051_vm1, %v5848_v54  ;;  %4279 = vmatprep.mubr.msk.f32.mxu1 %vm1051_vm1, %v5713_v23 }
 0x237   : > { %4201 = vmatprep.mubr.msk.f32.mxu0 %vm1051_vm1, %v5697_v21 }
 0x239   : > { %4280 = vmatmul.mubr.msk.f32.vlgmr.msra.gmra.mrb[10].mxu1 %vm1051_vm1, %v5719_v24 }
 0x23a   : > { %4304 = vmatpush3.msra.mxu1 %v2668_v42  ;;  %4202 = vmatmul.mubr.msk.f32.vlgmr.msra.gmra.mrb[16].mxu0 %vm1051_vm1, %v5706_v22 }
 0x23b   : > { %4282 = vmatprep.mubr.msk.f32.mxu1 %vm1051_vm1, %v5725_v25  ;;  %4204 = vmatprep.mubr.msk.f32.mxu0 %vm1051_vm1, %v5713_v23 }
 0x23c   : > { %4329 = vmatprep.subr.mxu1 %v2895_v58  ;;  %4356 = vmatpush3.msra.mxu0 %v3167_v62 }
 0x23d   : > { %4283 = vmatmul.mubr.msk.f32.gmra.mrb[12].mxu1 %vm1051_vm1, %v5731_v26 }
 0x23e   : > { %4205 = vmatmul.mubr.msk.f32.gmra.mrb[18].mxu0 %vm1051_vm1, %v5719_v24  ;;  %4285 = vmatprep.mubr.msk.f32.mxu1 %vm1051_vm1, %v5737_v27 }
 0x23f   : > { %4207 = vmatprep.mubr.msk.f32.mxu0 %vm1051_vm1, %v5725_v25 }
 0x241   : > { %4286 = vmatmul.mubr.msk.f32.gmra.mrb[14].mxu1 %vm1051_vm1, %v5743_v32 }
 0x242   : > { %4208 = vmatmul.mubr.msk.f32.gmra.mrb[20].mxu0 %vm1051_vm1, %v5731_v26  ;;  %4288 = vmatprep.mubr.msk.f32.mxu1 %vm1051_vm1, %v5749_v34 }
 0x243   : > { %4210 = vmatprep.mubr.msk.f32.mxu0 %vm1051_vm1, %v5737_v27 }
 0x245   : > { %4289 = vmatmul.mubr.msk.f32.gmra.mrb[16].mxu1 %vm1051_vm1, %v5755_v35 }
 0x246   : > { %4211 = vmatmul.mubr.msk.f32.gmra.mrb[22].mxu0 %vm1051_vm1, %v5743_v32  ;;  %4291 = vmatprep.mubr.msk.f32.mxu1 %vm1051_vm1, %v5645_v8 }
 0x247   : > { %4213 = vmatprep.mubr.msk.f32.mxu0 %vm1051_vm1, %v5749_v34 }
 0x249   : > { %4292 = vmatmul.mubr.msk.f32.gmra.mrb[18].mxu1 %vm1051_vm1, %v5647_v9 }
 0x24a   : > { %4214 = vmatmul.mubr.msk.f32.gmra.mrb[24].mxu0 %vm1051_vm1, %v5755_v35  ;;  %4294 = vmatprep.mubr.msk.f32.mxu1 %vm1051_vm1, %v5663_v12 }
 0x24d   : > { %4295 = vmatmul.mubr.msk.f32.gmra.mrb[4].mxu1 %vm1051_vm1, %v5665_v13 }
 0x24e   : > { %4297 = vmatprep.mubr.msk.f32.mxu1 %vm1051_vm1, %v5679_v15 }
 0x251   : > { %4298 = vmatmul.mubr.msk.f32.gmra.mrb[6].mxu1 %vm1051_vm1, %v5681_v16  ;;  %v5999_v16 = vld [vmem:[%s6354_s14] ss:$0 sm:$0xff]  ;;  %s4809_s14 = sshll.u32 %s4972_s23, 4  ;;  %s4810_s14 = int_to_ptr.vmem [resolvable:$false] %s4809_s14 }
 0x252   : > { %4300 = vmatprep.mubr.msk.f32.mxu1 %vm1051_vm1, %v2438_v59  ;;  %s4811_s15 = scalar_lea.vmem %s4810_s14, 4096  ;;  %p4812_p6 = scmp.lt.s32.totalorder %s6153_s13, %s4810_s14 }
 0x255   : > { %4301 = vmatmul.mubr.msk.f32.gmra.mrb[8].mxu1 %vm1051_vm1, %v2439_v60 }
 0x256   : > { %4305 = vmatprep.mubr.msk.f32.mxu1 %vm1051_vm1, %v5600_v30  ;;  %v2665_v30 = vld [vmem:[#allocation2 + $0x128] sm:$0xff] }
 0x259   : > { %4306 = vmatmul.mubr.msk.f32.vlgmr.msra.gmra.mrb[10].mxu1 %vm1051_vm1, %v5609_v53  ;;  %v2666_v53 = vld [vmem:[#allocation2 + $0x130] sm:$0xff] }
 0x25a   : > { %4330 = vmatpush3.msra.mxu1 %v2895_v58  ;;  %4308 = vmatprep.mubr.msk.f32.mxu1 %vm1051_vm1, %v5614_v56  ;;  %v2892_v56 = vld [vmem:[#allocation2 + $0x129] sm:$0xff] }
 0x25d   : > { %4309 = vmatmul.mubr.msk.f32.gmra.mrb[12].mxu1 %vm1051_vm1, %v5623_v63 }
 0x25e   : > { %4311 = vmatprep.mubr.msk.f32.mxu1 %vm1051_vm1, %v5628_v2 }
 0x261   : > { %4312 = vmatmul.mubr.msk.f32.gmra.mrb[14].mxu1 %vm1051_vm1, %v5636_v6 }
 0x262   : > { %4314 = vmatprep.mubr.msk.f32.mxu1 %vm1051_vm1, %v5640_v7 }
 0x265   : > { %4315 = vmatmul.mubr.msk.f32.gmra.mrb[16].mxu1 %vm1051_vm1, %v5654_v10 }
 0x266   : > { %4317 = vmatprep.mubr.msk.f32.mxu1 %vm1051_vm1, %v5659_v11 }
 0x269   : > { %4318 = vmatmul.mubr.msk.f32.gmra.mrb[18].mxu1 %vm1051_vm1, %v5671_v29  ;;  %v5994_v29 = vld [vmem:[%s6353_s24] ss:$0 sm:$0xff]  ;;  %s4805_s24 = scalar_lea.vmem %s6153_s13, 2048 }
 0x26a   : > { %4320 = vmatprep.mubr.msk.f32.mxu1 %vm1051_vm1, %v5675_v14  ;;  %p4806_p13 = scmp.ne.s32.totalorder %s6153_s13, %s4805_s24  ;;  %p4813_p2 = scmp.lt.s32.totalorder %s4811_s15, %s4805_s24 }
 0x26c   : > { %p4807_p8 = pnand %p4806_p13, %p6360_p12  ;;  %p4814_p3 = por %p4813_p2, %p4812_p6 }
 0x26d   : > { %4321 = vmatmul.mubr.msk.f32.gmra.mrb[4].mxu1 %vm1051_vm1, %v5687_v18 }
 0x26e   : > { %4323 = vmatprep.mubr.msk.f32.mxu1 %vm1051_vm1, %v5765_v36  ;;  %p4808_p11 = pneg %p4807_p8 }
 0x270   : > { %p4815_p0 = pnand %p4814_p3, %p4808_p11 }
 0x271   : > { %4324 = vmatmul.mubr.msk.f32.gmra.mrb[6].mxu1 %vm1051_vm1, %v5773_v37 }
 0x272   : > { %4326 = vmatprep.mubr.msk.f32.mxu1 %vm1051_vm1, %v2665_v30 }
 0x275   : > { %4327 = vmatmul.mubr.msk.f32.gmra.mrb[8].mxu1 %vm1051_vm1, %v2666_v53 }
 0x276   : > { %4331 = vmatprep.mubr.msk.f32.mxu1 %vm1051_vm1, %v5783_v43 }
 0x279   : > { %4332 = vmatmul.mubr.msk.f32.vlgmr.msra.gmra.mrb[10].mxu1 %vm1051_vm1, %v5788_v44 }
 0x27a   : > { %4334 = vmatprep.mubr.msk.f32.mxu1 %vm1051_vm1, %v5793_v45 }
 0x27d   : > { %4335 = vmatmul.mubr.msk.f32.gmra.mrb[12].mxu1 %vm1051_vm1, %v5800_v46 }
 0x27e   : > { %4337 = vmatprep.mubr.msk.f32.mxu1 %vm1051_vm1, %v5804_v47 }
 0x281   : > { %4338 = vmatmul.mubr.msk.f32.gmra.mrb[14].mxu1 %vm1051_vm1, %v5812_v28 }
 0x282   : > { %4340 = vmatprep.mubr.msk.f32.mxu1 %vm1051_vm1, %v5816_v48 }
 0x285   : > { %4341 = vmatmul.mubr.msk.f32.gmra.mrb[16].mxu1 %vm1051_vm1, %v5824_v49 }
 0x286   : > { %4343 = vmatprep.mubr.msk.f32.mxu1 %vm1051_vm1, %v5828_v50 }
 0x289   : > { %4344 = vmatmul.mubr.msk.f32.gmra.mrb[18].mxu1 %vm1051_vm1, %v5836_v51 }
 0x28a   : > { %4346 = vmatprep.mubr.msk.f32.mxu1 %vm1051_vm1, %v5840_v52 }
 0x28d   : > { %4347 = vmatmul.mubr.msk.f32.gmra.mrb[4].mxu1 %vm1051_vm1, %v5848_v54 }
 0x28e   : > { %4349 = vmatprep.mubr.msk.f32.mxu1 %vm1051_vm1, %v5852_v55 }
 0x291   : > { %4350 = vmatmul.mubr.msk.f32.gmra.mrb[6].mxu1 %vm1051_vm1, %v5860_v57 }
 0x292   : > { %4352 = vmatprep.mubr.msk.f32.mxu1 %vm1051_vm1, %v2892_v56 }
 0x295   : > { %4353 = vmatmul.mubr.msk.f32.gmra.mrb[8].mxu1 %vm1051_vm1, %v2893_v61 }
 0x301   : > { %v5979_v63 = vpop.f32.mrb[26].mxu0 }
 0x302   : > { %v5981_v0 = vpop.f32.mrb[27].mxu0 }
 0x305   : > { %v5983_v1 = vpop.f32.mrb[28].mxu0 }
 0x306   : > { %v5985_v2 = vpop.f32.mrb[29].mxu0 }
 0x309   : > { %v5987_v3 = vpop.f32.mrb[30].mxu0 }
 0x30a   : > { %v5989_v4 = vpop.f32.mrb[31].mxu0 }
 0x30d   : > { %v4203_v5 = vpop.f32.mrb[16].mxu0 }
 0x30e   : > { %v1874_v6 = vpop.f32.mrb[17].mxu0 }
 0x311   : > { %v4206_v31 = vpop.f32.mrb[18].mxu0 }
 0x312   : > { %v1884_v7 = vpop.f32.mrb[19].mxu0 }
 0x315   : > { %v4209_v8 = vpop.f32.mrb[20].mxu0 }
 0x316   : > { %v1894_v9 = vpop.f32.mrb[21].mxu0 }
 0x319   : > { %v4212_v33 = vpop.f32.mrb[22].mxu0 }
 0x31a   : > { %v1904_v10 = vpop.f32.mrb[23].mxu0 }
 0x31d   : > { %v4215_v11 = vpop.f32.mrb[24].mxu0 }
 0x31e   : > { %v1914_v12 = vpop.f32.mrb[25].mxu0 }
 0x34c   : > { %v4333_v13 = vpop.f32.mrb[10].mxu1 }
 0x34d   : > { %v4407_v14 = vadd.f32 %v4333_v13, %v4203_v5  ;;  %v3010_v15 = vpop.f32.mrb[11].mxu1 }
 0x34e   : > { %v4408_v17 = vadd.f32 %v3010_v15, %v1874_v6 }
 0x34f   : > { %v3113_v18 = vmul.f32 %v4407_v14, %v5994_v29 }
 0x350   : > { %v3112_v19 = vmul.f32 %v4408_v17, %v5994_v29  ;;  %v4336_v20 = vpop.f32.mrb[12].mxu1 }
 0x351   : > { %v3136_v21 = vadd.f32 %v5999_v16, %v3113_v18  ;;  %v4409_v22 = vadd.f32 %v4336_v20, %v4206_v31  ;;  %v3020_v23 = vpop.f32.mrb[13].mxu1 }
 0x352   : > { %v3135_v24 = vadd.f32 %v5999_v16, %v3112_v19  ;;  %v4410_v25 = vadd.f32 %v3020_v23, %v1884_v7 }
 0x353   : > { %v3115_v26 = vmul.f32 %v4409_v22, %v5994_v29  ;;  %v3152_v35 = vmax.f32 %v3136_v21, 0.0 }
 0x354   : > { %v3151_v27 = vmax.f32 %v3135_v24, 0.0  ;;  %v3114_v32 = vmul.f32 %v4410_v25, %v5994_v29  ;;  %v4339_v34 = vpop.f32.mrb[14].mxu1 }
 0x355   : > { %v3138_v36 = vadd.f32 %v5999_v16, %v3115_v26  ;;  %v4411_v37 = vadd.f32 %v4339_v34, %v4209_v8  ;;  %v3030_v38 = vpop.f32.mrb[15].mxu1 }
 0x356   : > { %v3137_v39 = vadd.f32 %v5999_v16, %v3114_v32  ;;  %v4412_v40 = vadd.f32 %v3030_v38, %v1894_v9  ;;  %4357 = vmatprep.mubr.msk.f32.mxu0 %vm1051_vm1, %v3151_v27 }
 0x357   : > { %v3117_v41 = vmul.f32 %v4411_v37, %v5994_v29  ;;  %4358 = vmatmul.mubr.msk.f32.vlgmr.msra.gmra.mrb[32].mxu0 %vm1051_vm1, %v3152_v35  ;;  %v3154_v45 = vmax.f32 %v3138_v36, 0.0 }
 0x358   : > { %v3153_v42 = vmax.f32 %v3137_v39, 0.0  ;;  %v3116_v43 = vmul.f32 %v4412_v40, %v5994_v29  ;;  %v4342_v44 = vpop.f32.mrb[16].mxu1  ;;  %v3362_v40 = vld [vmem:[%s5403_s0 + $0x8] sm:$0xff] }
 0x359   : > { %v3140_v46 = vadd.f32 %v5999_v16, %v3117_v41  ;;  %v4413_v47 = vadd.f32 %v4342_v44, %v4212_v33  ;;  %v3040_v28 = vpop.f32.mrb[17].mxu1 }
 0x35a   : > { %v3139_v48 = vadd.f32 %v5999_v16, %v3116_v43  ;;  %v4414_v49 = vadd.f32 %v3040_v28, %v1904_v10  ;;  %4360 = vmatprep.mubr.msk.f32.mxu0 %vm1051_vm1, %v3153_v42  ;;  %v3361_v43 = vld [vmem:[%s5403_s0] sm:$0xff] }
 0x35b   : > { %v3119_v50 = vmul.f32 %v4413_v47, %v5994_v29  ;;  %4361 = vmatmul.mubr.msk.f32.gmra.mrb[34].mxu0 %vm1051_vm1, %v3154_v45  ;;  %v3156_v55 = vmax.f32 %v3140_v46, 0.0 }
 0x35c   : > { %v3155_v51 = vmax.f32 %v3139_v48, 0.0  ;;  %v3118_v52 = vmul.f32 %v4414_v49, %v5994_v29  ;;  %v4345_v54 = vpop.f32.mrb[18].mxu1  ;;  %v3364_v49 = vld [vmem:[%s5403_s0 + $0x18] sm:$0xff] }
 0x35d   : > { %v3142_v57 = vadd.f32 %v5999_v16, %v3119_v50  ;;  %v4415_v58 = vadd.f32 %v4345_v54, %v4215_v11  ;;  %v3050_v59 = vpop.f32.mrb[19].mxu1  ;;  %v3363_v54 = vld [vmem:[%s5403_s0 + $0x10] sm:$0xff] }
 0x35e   : > { %v3141_v60 = vadd.f32 %v5999_v16, %v3118_v52  ;;  %v4416_v30 = vadd.f32 %v3050_v59, %v1914_v12  ;;  %4363 = vmatprep.mubr.msk.f32.mxu0 %vm1051_vm1, %v3155_v51 }
 0x35f   : > { %v3121_v53 = vmul.f32 %v4415_v58, %v5994_v29  ;;  %4364 = vmatmul.mubr.msk.f32.gmra.mrb[36].mxu0 %vm1051_vm1, %v3156_v55  ;;  %v3158_v5 = vmax.f32 %v3142_v57, 0.0 }
 0x360   : > { %v3157_v56 = vmax.f32 %v3141_v60, 0.0  ;;  %v3120_v61 = vmul.f32 %v4416_v30, %v5994_v29  ;;  %v4348_v62 = vpop.f32.mrb[4].mxu1 }
 0x361   : > { %v3144_v6 = vadd.f32 %v5999_v16, %v3121_v53  ;;  %v4417_v31 = vadd.f32 %v4348_v62, %v5979_v63  ;;  %v3060_v7 = vpop.f32.mrb[5].mxu1 }
 0x362   : > { %v3143_v8 = vadd.f32 %v5999_v16, %v3120_v61  ;;  %v4418_v9 = vadd.f32 %v3060_v7, %v5981_v0  ;;  %4366 = vmatprep.mubr.msk.f32.mxu0 %vm1051_vm1, %v3157_v56  ;;  %v3366_v56 = vld [vmem:[%s5403_s0 + $0x28] sm:$0xff] }
 0x363   : > { %v3123_v33 = vmul.f32 %v4417_v31, %v5994_v29  ;;  %4367 = vmatmul.mubr.msk.f32.gmra.mrb[38].mxu0 %vm1051_vm1, %v3158_v5  ;;  %v3160_v13 = vmax.f32 %v3144_v6, 0.0  ;;  %v3365_v6 = vld [vmem:[%s5403_s0 + $0x20] sm:$0xff] }
 0x364   : > { %v3159_v10 = vmax.f32 %v3143_v8, 0.0  ;;  %v3122_v11 = vmul.f32 %v4418_v9, %v5994_v29  ;;  %v4351_v12 = vpop.f32.mrb[6].mxu1 }
 0x365   : > { %v3146_v14 = vadd.f32 %v5999_v16, %v3123_v33  ;;  %v4419_v63 = vadd.f32 %v4351_v12, %v5983_v1  ;;  %v3070_v15 = vpop.f32.mrb[7].mxu1  ;;  %v3368_v12 = vld [vmem:[%s5403_s0 + $0x38] sm:$0xff] }
 0x366   : > { %v3145_v17 = vadd.f32 %v5999_v16, %v3122_v11  ;;  %v4420_v0 = vadd.f32 %v3070_v15, %v5985_v2  ;;  %4369 = vmatprep.mubr.msk.f32.mxu0 %vm1051_vm1, %v3159_v10  ;;  %v3367_v15 = vld [vmem:[%s5403_s0 + $0x30] sm:$0xff] }
 0x367   : > { %v3125_v18 = vmul.f32 %v4419_v63, %v5994_v29  ;;  %4370 = vmatmul.mubr.msk.f32.gmra.mrb[40].mxu0 %vm1051_vm1, %v3160_v13  ;;  %v3162_v22 = vmax.f32 %v3146_v14, 0.0 }
 0x368   : > { %v3161_v19 = vmax.f32 %v3145_v17, 0.0  ;;  %v3124_v20 = vmul.f32 %v4420_v0, %v5994_v29  ;;  %v4354_v21 = vpop.f32.mrb[8].mxu1 }
 0x369   : > { %v3148_v23 = vadd.f32 %v5999_v16, %v3125_v18  ;;  %v4421_v1 = vadd.f32 %v4354_v21, %v5987_v3  ;;  %v3080_v24 = vpop.f32.mrb[9].mxu1 }
 0x36a   : > { %v3147_v25 = vadd.f32 %v5999_v16, %v3124_v20  ;;  %v4422_v2 = vadd.f32 %v3080_v24, %v5989_v4  ;;  %4372 = vmatprep.mubr.msk.f32.mxu0 %vm1051_vm1, %v3161_v19 }
 0x36b   : > { %v3127_v26 = vmul.f32 %v4421_v1, %v5994_v29  ;;  %4373 = vmatmul.mubr.msk.f32.gmra.mrb[42].mxu0 %vm1051_vm1, %v3162_v22  ;;  %v3164_v34 = vmax.f32 %v3148_v23, 0.0  ;;  %v3370_v23 = vld [vmem:[%s5403_s0 + $0x48] sm:$0xff] }
 0x36c   : > { %v3163_v27 = vmax.f32 %v3147_v25, 0.0  ;;  %v3126_v32 = vmul.f32 %v4422_v2, %v5994_v29  ;;  %v6058_v29 = vld [vmem:[%s6355_s12] ss:$0 sm:$0xff] }
 0x36d   : > { %v3150_v35 = vadd.f32 %v5999_v16, %v3127_v26  ;;  %v3369_v2 = vld [vmem:[%s5403_s0 + $0x40] sm:$0xff] }
 0x36e   : > { %v3149_v3 = vadd.f32 %v5999_v16, %v3126_v32  ;;  %4375 = vmatprep.mubr.msk.f32.mxu0 %vm1051_vm1, %v3163_v27  ;;  %v6063_v16 = vld [vmem:[%s6356_s18] ss:$0 sm:$0xff] }
 0x36f   : > { %4376 = vmatmul.mubr.msk.f32.gmra.mrb[44].mxu0 %vm1051_vm1, %v3164_v34  ;;  %v3166_v36 = vmax.f32 %v3150_v35, 0.0 }
 0x370   : > { %v3165_v4 = vmax.f32 %v3149_v3, 0.0 }
 0x372   : > { %4378 = vmatprep.mubr.msk.f32.mxu0 %vm1051_vm1, %v3165_v4 }
 0x373   : > { %4379 = vmatmul.mubr.msk.f32.gmra.mrb[46].mxu0 %vm1051_vm1, %v3166_v36  ;;  %v3372_v36 = vld [vmem:[%s5403_s0 + $0x58] sm:$0xff] }
 0x42a   : > { %v4359_v37 = vpop.f32.mrb[32].mxu0 }
 0x42b   : > { %v3385_v38 = vmul.f32 %v4359_v37, %v6058_v29  ;;  %v3282_v39 = vpop.f32.mrb[33].mxu0 }
 0x42c   : > { %v3384_v41 = vmul.f32 %v6058_v29, %v3282_v39 }
 0x42d   : > { %v3408_v42 = vadd.f32 %v6063_v16, %v3385_v38 }
 0x42e   : > { %v3407_v44 = vadd.f32 %v6063_v16, %v3384_v41  ;;  %v4362_v45 = vpop.f32.mrb[34].mxu0 }
 0x42f   : > { %v3424_v46 = vadd.f32 %v3408_v42, %v3362_v40  ;;  %v3387_v47 = vmul.f32 %v4362_v45, %v6058_v29  ;;  %v3292_v28 = vpop.f32.mrb[35].mxu0  ;;  %v3371_v40 = vld [vmem:[%s5403_s0 + $0x50] sm:$0xff] }
 0x430   : > { %v3423_v48 = vadd.f32 %v3407_v44, %v3361_v43  ;;  %v3386_v50 = vmul.f32 %v6058_v29, %v3292_v28  ;;  %v3374_v28 = vld [vmem:[%s5403_s0 + $0x68] sm:$0xff] }
 0x431   : > { %v3440_v51 = vmax.f32 %v3424_v46, 0.0  ;;  %v3410_v52 = vadd.f32 %v6063_v16, %v3387_v47 }
 0x432   : > { %v3439_v55 = vmax.f32 %v3423_v48, 0.0  ;;  %v3409_v57 = vadd.f32 %v6063_v16, %v3386_v50  ;;  %v4365_v58 = vpop.f32.mrb[36].mxu0 }
 0x433   : > { %3456 = vst.msk [vmem:[%s6079_s3 + $0x8] sm:$0xff] %vm605_vm0, %v3440_v51  ;;  %v3426_v59 = vadd.f32 %v3410_v52, %v3364_v49  ;;  %v3389_v60 = vmul.f32 %v4365_v58, %v6058_v29  ;;  %v3302_v30 = vpop.f32.mrb[37].mxu0  ;;  %v3373_v51 = vld [vmem:[%s5403_s0 + $0x60] sm:$0xff] }
 0x434   : > { %3455 = vst.msk [vmem:[%s6079_s3] sm:$0xff] %vm605_vm0, %v3439_v55  ;;  %v3425_v53 = vadd.f32 %v3409_v57, %v3363_v54  ;;  %v3388_v61 = vmul.f32 %v6058_v29, %v3302_v30  ;;  %v3376_v30 = vld [vmem:[%s5403_s0 + $0x78] sm:$0xff] }
 0x435   : > { %v3442_v62 = vmax.f32 %v3426_v59, 0.0  ;;  %v3412_v5 = vadd.f32 %v6063_v16, %v3389_v60 }
 0x436   : > { %v3441_v31 = vmax.f32 %v3425_v53, 0.0  ;;  %v3411_v7 = vadd.f32 %v6063_v16, %v3388_v61  ;;  %v4368_v8 = vpop.f32.mrb[38].mxu0 }
 0x437   : > { %3458 = vst.msk [vmem:[%s6079_s3 + $0x18] sm:$0xff] %vm605_vm0, %v3442_v62  ;;  %v3428_v9 = vadd.f32 %v3412_v5, %v3366_v56  ;;  %v3391_v33 = vmul.f32 %v4368_v8, %v6058_v29  ;;  %v3312_v10 = vpop.f32.mrb[39].mxu0  ;;  %v3375_v62 = vld [vmem:[%s5403_s0 + $0x70] sm:$0xff]  ;;  %s3472_s0 = scalar_lea.sflag [#allocation5], %s5397_s11 }
 0x438   : > { %3457 = vst.msk [vmem:[%s6079_s3 + $0x10] sm:$0xff] %vm605_vm0, %v3441_v31  ;;  %v3427_v11 = vadd.f32 %v3411_v7, %v3365_v6  ;;  %v3390_v13 = vmul.f32 %v6058_v29, %v3312_v10 }
 0x439   : > { %v3444_v14 = vmax.f32 %v3428_v9, 0.0  ;;  %v3414_v63 = vadd.f32 %v6063_v16, %v3391_v33 }
 0x43a   : > { %v3443_v17 = vmax.f32 %v3427_v11, 0.0  ;;  %v3413_v0 = vadd.f32 %v6063_v16, %v3390_v13  ;;  %v4371_v18 = vpop.f32.mrb[40].mxu0 }
 0x43b   : > { %3460 = vst.msk [vmem:[%s6079_s3 + $0x28] sm:$0xff] %vm605_vm0, %v3444_v14  ;;  %v3430_v19 = vadd.f32 %v3414_v63, %v3368_v12  ;;  %v3393_v20 = vmul.f32 %v4371_v18, %v6058_v29  ;;  %v3322_v21 = vpop.f32.mrb[41].mxu0 }
 0x43c   : > { %3459 = vst.msk [vmem:[%s6079_s3 + $0x20] sm:$0xff] %vm605_vm0, %v3443_v17  ;;  %v3429_v22 = vadd.f32 %v3413_v0, %v3367_v15  ;;  %v3392_v1 = vmul.f32 %v6058_v29, %v3322_v21 }
 0x43d   : > { %v3446_v24 = vmax.f32 %v3430_v19, 0.0  ;;  %v3416_v25 = vadd.f32 %v6063_v16, %v3393_v20 }
 0x43e   : > { %v3445_v26 = vmax.f32 %v3429_v22, 0.0  ;;  %v3415_v27 = vadd.f32 %v6063_v16, %v3392_v1  ;;  %v4374_v32 = vpop.f32.mrb[42].mxu0 }
 0x43f   : > { %3462 = vst.msk [vmem:[%s6079_s3 + $0x38] sm:$0xff] %vm605_vm0, %v3446_v24  ;;  %v3432_v34 = vadd.f32 %v3416_v25, %v3370_v23  ;;  %v3395_v35 = vmul.f32 %v4374_v32, %v6058_v29  ;;  %v3332_v3 = vpop.f32.mrb[43].mxu0 }
 0x440   : > { %3461 = vst.msk [vmem:[%s6079_s3 + $0x30] sm:$0xff] %vm605_vm0, %v3445_v26  ;;  %v3431_v4 = vadd.f32 %v3415_v27, %v3369_v2  ;;  %v3394_v37 = vmul.f32 %v6058_v29, %v3332_v3 }
 0x441   : > { %v3448_v38 = vmax.f32 %v3432_v34, 0.0  ;;  %v3418_v39 = vadd.f32 %v6063_v16, %v3395_v35 }
 0x442   : > { %v3447_v41 = vmax.f32 %v3431_v4, 0.0  ;;  %v3417_v42 = vadd.f32 %v6063_v16, %v3394_v37  ;;  %v4377_v43 = vpop.f32.mrb[44].mxu0 }
 0x443   : > { %3464 = vst.msk [vmem:[%s6079_s3 + $0x48] sm:$0xff] %vm605_vm0, %v3448_v38  ;;  %v3434_v44 = vadd.f32 %v3418_v39, %v3372_v36  ;;  %v3397_v45 = vmul.f32 %v4377_v43, %v6058_v29  ;;  %v3342_v46 = vpop.f32.mrb[45].mxu0 }
 0x444   : > { %3463 = vst.msk [vmem:[%s6079_s3 + $0x40] sm:$0xff] %vm605_vm0, %v3447_v41  ;;  %v3433_v47 = vadd.f32 %v3417_v42, %v3371_v40  ;;  %v3396_v48 = vmul.f32 %v6058_v29, %v3342_v46 }
 0x445   : > { %v3450_v49 = vmax.f32 %v3434_v44, 0.0  ;;  %v3420_v50 = vadd.f32 %v6063_v16, %v3397_v45 }
 0x446   : > { %v3449_v52 = vmax.f32 %v3433_v47, 0.0  ;;  %v3419_v54 = vadd.f32 %v6063_v16, %v3396_v48  ;;  %v4380_v55 = vpop.f32.mrb[46].mxu0 }
 0x447   : > { %3466 = vst.msk [vmem:[%s6079_s3 + $0x58] sm:$0xff] %vm605_vm0, %v3450_v49  ;;  %v3436_v57 = vadd.f32 %v3420_v50, %v3374_v28  ;;  %v3399_v58 = vmul.f32 %v4380_v55, %v6058_v29  ;;  %v3352_v59 = vpop.f32.mrb[47].mxu0 }
 0x448   : > { %3465 = vst.msk [vmem:[%s6079_s3 + $0x50] sm:$0xff] %vm605_vm0, %v3449_v52  ;;  %v3435_v60 = vadd.f32 %v3419_v54, %v3373_v51  ;;  %v3398_v53 = vmul.f32 %v6058_v29, %v3352_v59 }
 0x449   : > { %v3452_v56 = vmax.f32 %v3436_v57, 0.0  ;;  %v3422_v61 = vadd.f32 %v6063_v16, %v3399_v58 }
 0x44a   : > { %v3451_v5 = vmax.f32 %v3435_v60, 0.0  ;;  %v3421_v6 = vadd.f32 %v6063_v16, %v3398_v53 }
 0x44b   : > { %3468 = vst.msk [vmem:[%s6079_s3 + $0x68] sm:$0xff] %vm605_vm0, %v3452_v56  ;;  %v3438_v31 = vadd.f32 %v3422_v61, %v3376_v30 }
 0x44c   : > { %3467 = vst.msk [vmem:[%s6079_s3 + $0x60] sm:$0xff] %vm605_vm0, %v3451_v5  ;;  %v3437_v7 = vadd.f32 %v3421_v6, %v3375_v62 }
 0x44d   : > { %v3454_v29 = vmax.f32 %v3438_v31, 0.0 }
 0x44e   : > { %v3453_v16 = vmax.f32 %v3437_v7, 0.0 }
 0x44f   : > { %3470 = vst.msk [vmem:[%s6079_s3 + $0x78] sm:$0xff] %vm605_vm0, %v3454_v29 }
 0x450   : > { %3469 = vst.msk [vmem:[%s6079_s3 + $0x70] sm:$0xff] %vm605_vm0, %v3453_v16 }
 0x451   : > { %4818 = shalt.err (!%p4815_p0)
}
 0x452   : > { %s4819_s10 = scalar_lea.hbm %s6151_s29, 2048  ;;  %s4823_s5 = scalar_lea.hbm %s6359_s6, 8192 }
 0x453   : > { %p4820_p9 = scmp.ne.s32.totalorder %s6151_s29, %s4819_s10  ;;  %p4824_p10 = scmp.lt.u32.totalorder %s6151_s29, %s6359_s6 }
 0x454   : > { %p4825_p7 = scmp.lt.u32.totalorder %s4823_s5, %s4819_s10  ;;  %p4827_p13 = scmp.lt.u32.totalorder %s4819_s10, %s6151_s29 }
 0x455   : > { %p4821_p5 = pnand %p4820_p9, %p6360_p12 }
 0x456   : > { %p4826_p1 = por %p4825_p7, %p4824_p10 }
 0x457   : > { %p4822_p4 = pneg %p4821_p5 }
 0x458   : > { %p4828_p8 = por %p4827_p13, %p4826_p1 }
 0x45a   : > { %p4829_p11 = pnand %p4828_p8, %p4822_p4 }
 0x45c   : > { %4832 = shalt.err (!%p4829_p11)
}
 0x45d   : > { %s4973_s1 = smov 128   ;;  %s4974_s8 = smov 8  }
 0x45e   : > { %4545 = dma.vmem_to_hbm [thread:$0]  (%p6360_p12), %s6153_s13, 2048, %s6151_s29, %s3472_s0, %s4973_s1, %s4973_s1, %s4974_s8  }
 0x45f PF: > { %s6361_s21 = sld [smem:[#allocation32_spill]]  ;;  %p4568_p6 = scmp.ge.s32.totalorder %s4963_s16, 2 }
 0x460   : > { %s3503_s19 = sand.u32 1, %s4935_s27  }
 0x461   : > { %s3504_s30 = scalar_lea.sflag [#allocation5], %s3503_s19 }
 0x465   : > { %p6362_p2 = scmp.ne.s32.totalorder %s6361_s21, 0 }
 0x467   : > { %p4562_p3 = pnand %p4568_p6, %p6362_p2 }
 0x469   : > { %4906 = dma.done.wait (!%p4562_p3), %s3504_s30, 2048  }
 0x46a   : > { %4908 = vsyncadd (!%p4562_p3), %s3504_s30, 4294965248  ;;  %s32_s16 = sadd.s32 1, %s4963_s16   ;;  %s6364_s21 = sld [smem:[#allocation18_spill]] }
 0x46b   : > { %p6188_p0 = scmp.ge.s32.totalorder %s32_s16, 6   ;;  %s6365_s22 = sld [smem:[#allocation19_spill]] }
 0x46c   : > { %s6366_s20 = sld [smem:[#allocation20_spill]]  ;;  %s6367_s26 = sld [smem:[#allocation30_spill]] }
 0x46d   : > { %s6368_s11 = sld [smem:[#allocation21_spill]]  ;;  %s6369_s29 = sld [smem:[#allocation31_spill]] }
 0x46e   : > { %s6370_s30 = sld [smem:[#allocation24_spill]]  ;;  %s6371_s13 = sld [smem:[#allocation25_spill]] }
 0x46f   : > { %s6372_s14 = sld [smem:[#allocation26_spill]]  ;;  %s6373_s15 = sld [smem:[#allocation27_spill]] }
 0x470   : > { %s6374_s23 = smov %s6394_s17  ;;  %s6375_s24 = smov %s4927_s25 }
 0x471   : > { %s6377_s27 = smov %s4939_s28  ;;  %31 = sbr.rel (!%p6188_p0) target bundleno = 27 (0x1b), region = 152 }
 0x472   : > { %s6376_s25 = smov %s6366_s20 }
 0x473   : > { %s6378_s28 = smov %s6368_s11 }
 0x478   :  { %3509 = vsyncpa [#allocation4], 1 }
 0x479   :  { %3511 = vsyncpa [#allocation4 + $0x1], 1 }
 0x47a   :  { %3512 = vsyncpa [#allocation7], 1 }
 0x47b   :  { %3514 = vsyncpa [#allocation7 + $0x1], 1 }
 0x47c   :  { %3515 = vsyncpa [#allocation10], 1 }
 0x47d   :  { %3516 = vsyncpa [#allocation5], 1 }
 0x47e   :  { %3518 = vsyncpa [#allocation5 + $0x1], 1 }

</bundles_post_ra>
